<compile_context>
chip_gen: v7x
topology: tpu7x:2x2x1
jax: 0.10.0
libtpu: 0.0.40
codegen_flags: <defaults>
</compile_context>

<pallas_src>
import math
import functools

import jax
import jax.numpy as jnp
from jax.experimental import pallas as pl
from jax.experimental.pallas import tpu as pltpu


def _conv1d_gn_relu_kernel(x_ref, w_ref, g_ref, b_ref, seg_ref, segt_ref,
                           o_ref, *, K, L, B, G, cpg, pad, eps, act):
    # x_ref:    (B, C_in, L)        unpadded input rows for this batch block
    # w_ref:    (C_out, C_in*K)     column index = k*C_in + c
    # g_ref/b_ref: (C_out, 1)       GroupNorm affine params (f32)
    # seg_ref:  (B*L, B)            seg[b*L + l, b'] = 1 iff b == b'
    # segt_ref: (B, B*L)            transpose of seg (broadcast matrix)
    # o_ref:    (1, C_out, B*L)     lane-dense output slab
    C_in = x_ref.shape[1]
    C_out = w_ref.shape[0]

    x = x_ref[...]                             # (B, C_in, L), input dtype
    in_dt = x.dtype

    # Fused zero padding + im2col, built per batch with cheap 2-D slices:
    #   slab[k*C_in + c, b*L + l] = x_padded[b, c, k + l]
    if pad > 0:
        zpad = jnp.zeros((C_in, pad), in_dt)
    xps = []
    for b in range(B):                         # B, K are small static ints
        xb = x[b]                              # (C_in, L)
        xps.append(jnp.concatenate([zpad, xb, zpad], axis=-1) if pad > 0 else xb)
    rows = []
    for k in range(K):
        rows.append(jnp.concatenate([xps[b][:, k:k + L] for b in range(B)],
                                    axis=-1))  # (C_in, B*L)
    slab = jnp.concatenate(rows, axis=0)       # (C_in*K, B*L)

    # Single MXU push, contraction depth C_in*K, f32 accumulation.
    acc = jnp.dot(w_ref[...], slab,
                  preferred_element_type=jnp.float32)          # (C_out, B*L)

    # ---- GroupNorm (per sample, per group) + ReLU epilogue, all f32 ----
    seg = seg_ref[...]                                          # (B*L, B)
    s1 = jnp.dot(acc, seg, preferred_element_type=jnp.float32)        # (C_out, B)
    s2 = jnp.dot(acc * acc, seg, preferred_element_type=jnp.float32)  # (C_out, B)

    # Reduce over channels-per-group: splits only the leading/sublane dim.
    g1 = jnp.sum(s1.reshape(G, cpg, B), axis=1, keepdims=True)  # (G, 1, B)
    g2 = jnp.sum(s2.reshape(G, cpg, B), axis=1, keepdims=True)  # (G, 1, B)
    cnt = float(cpg * L)
    mean = g1 / cnt
    var = jnp.maximum(g2 / cnt - mean * mean, 0.0)              # one-pass var
    rstd = jax.lax.rsqrt(var + eps)                             # (G, 1, B)

    gamma = g_ref[...].reshape(G, cpg, 1)
    beta = b_ref[...].reshape(G, cpg, 1)
    scale = (rstd * gamma).reshape(C_out, B)                    # (C_out, B)
    shift = (beta - mean * rstd * gamma).reshape(C_out, B)      # (C_out, B)

    # Broadcast per-(channel,batch) affine back onto the lane axis via matmul.
    segt = segt_ref[...]                                        # (B, B*L)
    scale_full = jnp.dot(scale, segt, preferred_element_type=jnp.float32)
    shift_full = jnp.dot(shift, segt, preferred_element_type=jnp.float32)

    out = acc * scale_full + shift_full
    if act:
        out = jnp.maximum(out, 0.0)
    o_ref[0] = out.astype(o_ref.dtype)


def conv1d_gn_relu(x, weight, gamma, beta, *, ng=32, eps=1e-5, act=True,
                   lane_target=128):
    """Conv1d(kernel_size=K, stride=1, padding=(K-1)//2, bias=False)
       -> GroupNorm(gcd(ng, C_out), C_out) -> ReLU, matching the PyTorch module."""
    N, C_in, L = x.shape
    C_out, C_in_w, K = weight.shape
    assert C_in == C_in_w
    assert K % 2 == 1, "only odd kernel sizes (stride=1) supported"
    pad = (K - 1) // 2
    G = math.gcd(ng, C_out)
    cpg = C_out // G

    # Batch-packing factor: pack B samples on the lane axis (B*L -> ~128).
    # TODO(synk): for very large L / channel counts (and v7x's 64 MiB VMEM),
    # tile L with an 'arbitrary' grid axis carrying partial GroupNorm sums.
    B = max(1, min(N, (lane_target + L - 1) // L))
    NB = -(-N // B)
    Npad = NB * B
    if Npad != N:
        x = jnp.pad(x, ((0, Npad - N), (0, 0), (0, 0)))  # pad batch only (tiny)

    # 2-D weight layout: (C_out, C_in*K), column index = k*C_in + c.
    w2 = jnp.transpose(weight, (0, 2, 1)).reshape(C_out, K * C_in).astype(x.dtype)
    gamma2 = gamma.reshape(C_out, 1).astype(jnp.float32)
    beta2 = beta.reshape(C_out, 1).astype(jnp.float32)

    # Segment matrices for per-batch stats / broadcast along the packed lanes.
    seg = ((jnp.arange(B * L) // L)[:, None] ==
           jnp.arange(B)[None, :]).astype(jnp.float32)          # (B*L, B)
    segt = seg.T                                                # (B, B*L)

    kernel = functools.partial(_conv1d_gn_relu_kernel, K=K, L=L, B=B, G=G,
                               cpg=cpg, pad=pad, eps=eps, act=act)

    out = pl.pallas_call(
        kernel,
        out_shape=jax.ShapeDtypeStruct((NB, C_out, B * L), x.dtype),
        grid_spec=pltpu.PrefetchScalarGridSpec(
            num_scalar_prefetch=0,
            grid=(NB,),
            in_specs=[
                pl.BlockSpec((B, C_in, L), lambda i: (i, 0, 0)),
                pl.BlockSpec((C_out, K * C_in), lambda i: (0, 0)),
                pl.BlockSpec((C_out, 1), lambda i: (0, 0)),
                pl.BlockSpec((C_out, 1), lambda i: (0, 0)),
                pl.BlockSpec((B * L, B), lambda i: (0, 0)),
                pl.BlockSpec((B, B * L), lambda i: (0, 0)),
            ],
            out_specs=pl.BlockSpec((1, C_out, B * L), lambda i: (i, 0, 0)),
        ),
        compiler_params=pltpu.CompilerParams(
            dimension_semantics=("parallel",)),
    )(x, w2, gamma2, beta2, seg, segt)

    # Unpack lane-packed batches back to (N, C_out, L) — layout plumbing only.
    out = out.reshape(NB, C_out, B, L).transpose(0, 2, 1, 3).reshape(Npad, C_out, L)
    return out[:N]


def _reference(x, weight, gamma, beta, *, ng=32, eps=1e-5, act=True):
    """Pure-JAX reference for correctness checking."""
    N, C_in, L = x.shape
    C_out, _, K = weight.shape
    pad = (K - 1) // 2
    G = math.gcd(ng, C_out)
    cpg = C_out // G
    xp = jnp.pad(x, ((0, 0), (0, 0), (pad, pad)))
    cols = jnp.stack([xp[:, :, k:k + L] for k in range(K)], axis=-1)  # (N,Cin,L,K)
    out = jnp.einsum('nclk,ock->nol', cols, weight)
    y = out.reshape(N, G, cpg * L)
    mean = y.mean(axis=-1, keepdims=True)
    var = ((y - mean) ** 2).mean(axis=-1, keepdims=True)
    yn = ((y - mean) / jnp.sqrt(var + eps)).reshape(N, C_out, L)
    yn = yn * gamma[None, :, None] + beta[None, :, None]
    if act:
        yn = jnp.maximum(yn, 0.0)
    return yn


if __name__ == "__main__":
    # Module config: Conv1d(n_in=4, n_out=32, kernel_size=3, stride=1, norm='GN', ng=32)
    N, C_in, C_out, L, K = 2, 4, 32, 16, 3

    key = jax.random.PRNGKey(0)
    kx, kw = jax.random.split(key)
    x = jax.random.normal(kx, (N, C_in, L), dtype=jnp.float32)
    fan_in = C_in * K
    weight = jax.random.normal(kw, (C_out, C_in, K), dtype=jnp.float32) / math.sqrt(fan_in)
    gamma = jnp.ones((C_out,), dtype=jnp.float32)   # GroupNorm weight
    beta = jnp.zeros((C_out,), dtype=jnp.float32)   # GroupNorm bias

    out = conv1d_gn_relu(x, weight, gamma, beta, ng=32, act=True)
    out = jax.block_until_ready(out)

    ref = _reference(x, weight, gamma, beta, ng=32, act=True)
    assert out.shape == (N, C_out, L)
    assert jnp.allclose(out, ref, atol=1e-4, rtol=1e-4), "mismatch vs reference"

    print("KERNEL_OK")
</pallas_src>

<mosaic_0001>
module attributes {stable_mosaic.version = 11 : i64} {
  func.func @_conv1d_gn_relu_kernel(%arg0: i32, %arg1: memref<2x4x16xf32, #tpu.memory_space<vmem>>, %arg2: memref<32x12xf32, #tpu.memory_space<vmem>>, %arg3: memref<32x1xf32, #tpu.memory_space<vmem>>, %arg4: memref<32x1xf32, #tpu.memory_space<vmem>>, %arg5: memref<32x2xf32, #tpu.memory_space<vmem>>, %arg6: memref<2x32xf32, #tpu.memory_space<vmem>>, %arg7: memref<1x32x32xf32, #tpu.memory_space<vmem>>) attributes {dimension_semantics = [#tpu.dimension_semantics<parallel>], iteration_bounds = array<i64: 1>, scalar_prefetch = 0 : i64, scratch_operands = 0 : i64, tpu.core_type = #tpu.core_type<tc>, window_params = [{transform_indices = @transform_0, window_bounds = array<i64: 2, 4, 16>}, {pipeline_mode = #tpu.pipeline_mode<synchronous>, transform_indices = @transform_1, window_bounds = array<i64: 32, 12>}, {pipeline_mode = #tpu.pipeline_mode<synchronous>, transform_indices = @transform_2, window_bounds = array<i64: 32, 1>}, {pipeline_mode = #tpu.pipeline_mode<synchronous>, transform_indices = @transform_3, window_bounds = array<i64: 32, 1>}, {pipeline_mode = #tpu.pipeline_mode<synchronous>, transform_indices = @transform_4, window_bounds = array<i64: 32, 2>}, {pipeline_mode = #tpu.pipeline_mode<synchronous>, transform_indices = @transform_5, window_bounds = array<i64: 2, 32>}, {transform_indices = @transform_6, window_bounds = array<i64: 1, 32, 32>}]} {
    %c0 = arith.constant 0 : index
    %c0_0 = arith.constant 0 : index
    %c0_1 = arith.constant 0 : index
    %0 = vector.load %arg1[%c0, %c0_0, %c0_1] : memref<2x4x16xf32, #tpu.memory_space<vmem>>, vector<2x4x16xf32>
    %cst = arith.constant 0.000000e+00 : f32
    %1 = vector.broadcast %cst : f32 to vector<4x1xf32>
    %2 = vector.extract_strided_slice %0 {offsets = [0, 0, 0], sizes = [1, 4, 16], strides = [1, 1, 1]} : vector<2x4x16xf32> to vector<1x4x16xf32>
    %3 = vector.shape_cast %2 : vector<1x4x16xf32> to vector<4x16xf32>
    %4 = tpu.concatenate %1, %3, %1 in 1 : vector<4x1xf32>, vector<4x16xf32>, vector<4x1xf32> -> vector<4x18xf32>
    %5 = vector.extract_strided_slice %0 {offsets = [1, 0, 0], sizes = [1, 4, 16], strides = [1, 1, 1]} : vector<2x4x16xf32> to vector<1x4x16xf32>
    %6 = vector.shape_cast %5 : vector<1x4x16xf32> to vector<4x16xf32>
    %7 = tpu.concatenate %1, %6, %1 in 1 : vector<4x1xf32>, vector<4x16xf32>, vector<4x1xf32> -> vector<4x18xf32>
    %8 = vector.extract_strided_slice %4 {offsets = [0, 0], sizes = [4, 16], strides = [1, 1]} : vector<4x18xf32> to vector<4x16xf32>
    %9 = vector.extract_strided_slice %7 {offsets = [0, 0], sizes = [4, 16], strides = [1, 1]} : vector<4x18xf32> to vector<4x16xf32>
    %10 = tpu.concatenate %8, %9 in 1 : vector<4x16xf32>, vector<4x16xf32> -> vector<4x32xf32>
    %11 = vector.extract_strided_slice %4 {offsets = [0, 1], sizes = [4, 16], strides = [1, 1]} : vector<4x18xf32> to vector<4x16xf32>
    %12 = vector.extract_strided_slice %7 {offsets = [0, 1], sizes = [4, 16], strides = [1, 1]} : vector<4x18xf32> to vector<4x16xf32>
    %13 = tpu.concatenate %11, %12 in 1 : vector<4x16xf32>, vector<4x16xf32> -> vector<4x32xf32>
    %14 = vector.extract_strided_slice %4 {offsets = [0, 2], sizes = [4, 16], strides = [1, 1]} : vector<4x18xf32> to vector<4x16xf32>
    %15 = vector.extract_strided_slice %7 {offsets = [0, 2], sizes = [4, 16], strides = [1, 1]} : vector<4x18xf32> to vector<4x16xf32>
    %16 = tpu.concatenate %14, %15 in 1 : vector<4x16xf32>, vector<4x16xf32> -> vector<4x32xf32>
    %17 = tpu.concatenate %10, %13, %16 in 0 : vector<4x32xf32>, vector<4x32xf32>, vector<4x32xf32> -> vector<12x32xf32>
    %c0_2 = arith.constant 0 : index
    %c0_3 = arith.constant 0 : index
    %18 = vector.load %arg2[%c0_2, %c0_3] : memref<32x12xf32, #tpu.memory_space<vmem>>, vector<32x12xf32>
    %cst_4 = arith.constant dense<0.000000e+00> : vector<32x32xf32>
    %19 = tpu.matmul %18, %17, %cst_4 {dimension_numbers = #tpu.dot_dimension_numbers<[1], [0], [0], [1], [0, 0, 1, 1], [], []>} : vector<32x12xf32>, vector<12x32xf32>, vector<32x32xf32> -> vector<32x32xf32>
    %c0_5 = arith.constant 0 : index
    %c0_6 = arith.constant 0 : index
    %20 = vector.load %arg5[%c0_5, %c0_6] : memref<32x2xf32, #tpu.memory_space<vmem>>, vector<32x2xf32>
    %cst_7 = arith.constant dense<0.000000e+00> : vector<32x2xf32>
    %21 = tpu.matmul %19, %20, %cst_7 {dimension_numbers = #tpu.dot_dimension_numbers<[1], [0], [0], [1], [0, 0, 1, 1], [], []>} : vector<32x32xf32>, vector<32x2xf32>, vector<32x2xf32> -> vector<32x2xf32>
    %22 = arith.mulf %19, %19 : vector<32x32xf32>
    %cst_8 = arith.constant dense<0.000000e+00> : vector<32x2xf32>
    %23 = tpu.matmul %22, %20, %cst_8 {dimension_numbers = #tpu.dot_dimension_numbers<[1], [0], [0], [1], [0, 0, 1, 1], [], []>} : vector<32x32xf32>, vector<32x2xf32>, vector<32x2xf32> -> vector<32x2xf32>
    %24 = vector.shape_cast %21 : vector<32x2xf32> to vector<32x1x2xf32>
    %cst_9 = arith.constant dense<0.000000e+00> : vector<32x2xf32>
    %25 = vector.multi_reduction <add>, %24, %cst_9 [1] : vector<32x1x2xf32> to vector<32x2xf32>
    %26 = vector.shape_cast %25 : vector<32x2xf32> to vector<32x1x2xf32>
    %27 = vector.shape_cast %23 : vector<32x2xf32> to vector<32x1x2xf32>
    %cst_10 = arith.constant dense<0.000000e+00> : vector<32x2xf32>
    %28 = vector.multi_reduction <add>, %27, %cst_10 [1] : vector<32x1x2xf32> to vector<32x2xf32>
    %29 = vector.shape_cast %28 : vector<32x2xf32> to vector<32x1x2xf32>
    %cst_11 = arith.constant 1.600000e+01 : f32
    %30 = vector.broadcast %cst_11 : f32 to vector<32x1x2xf32>
    %31 = arith.divf %26, %30 : vector<32x1x2xf32>
    %cst_12 = arith.constant 1.600000e+01 : f32
    %32 = vector.broadcast %cst_12 : f32 to vector<32x1x2xf32>
    %33 = arith.divf %29, %32 : vector<32x1x2xf32>
    %34 = arith.mulf %31, %31 : vector<32x1x2xf32>
    %35 = arith.subf %33, %34 : vector<32x1x2xf32>
    %cst_13 = arith.constant 0.000000e+00 : f32
    %36 = vector.broadcast %cst_13 : f32 to vector<32x1x2xf32>
    %37 = arith.maximumf %35, %36 : vector<32x1x2xf32>
    %cst_14 = arith.constant 9.99999974E-6 : f32
    %38 = vector.broadcast %cst_14 : f32 to vector<32x1x2xf32>
    %39 = arith.addf %37, %38 : vector<32x1x2xf32>
    %40 = math.rsqrt %39 : vector<32x1x2xf32>
    %c0_15 = arith.constant 0 : index
    %c0_16 = arith.constant 0 : index
    %41 = vector.load %arg3[%c0_15, %c0_16] : memref<32x1xf32, #tpu.memory_space<vmem>>, vector<32x1xf32>
    %42 = vector.shape_cast %41 : vector<32x1xf32> to vector<32x1x1xf32>
    %c0_17 = arith.constant 0 : index
    %c0_18 = arith.constant 0 : index
    %43 = vector.load %arg4[%c0_17, %c0_18] : memref<32x1xf32, #tpu.memory_space<vmem>>, vector<32x1xf32>
    %44 = vector.shape_cast %43 : vector<32x1xf32> to vector<32x1x1xf32>
    %45 = vector.broadcast %42 : vector<32x1x1xf32> to vector<32x1x2xf32>
    %46 = arith.mulf %40, %45 : vector<32x1x2xf32>
    %47 = vector.shape_cast %46 : vector<32x1x2xf32> to vector<32x2xf32>
    %48 = arith.mulf %31, %40 : vector<32x1x2xf32>
    %49 = vector.broadcast %42 : vector<32x1x1xf32> to vector<32x1x2xf32>
    %50 = arith.mulf %48, %49 : vector<32x1x2xf32>
    %51 = vector.broadcast %44 : vector<32x1x1xf32> to vector<32x1x2xf32>
    %52 = arith.subf %51, %50 : vector<32x1x2xf32>
    %53 = vector.shape_cast %52 : vector<32x1x2xf32> to vector<32x2xf32>
    %c0_19 = arith.constant 0 : index
    %c0_20 = arith.constant 0 : index
    %54 = vector.load %arg6[%c0_19, %c0_20] : memref<2x32xf32, #tpu.memory_space<vmem>>, vector<2x32xf32>
    %cst_21 = arith.constant dense<0.000000e+00> : vector<32x32xf32>
    %55 = tpu.matmul %47, %54, %cst_21 {dimension_numbers = #tpu.dot_dimension_numbers<[1], [0], [0], [1], [0, 0, 1, 1], [], []>} : vector<32x2xf32>, vector<2x32xf32>, vector<32x32xf32> -> vector<32x32xf32>
    %cst_22 = arith.constant dense<0.000000e+00> : vector<32x32xf32>
    %56 = tpu.matmul %53, %54, %cst_22 {dimension_numbers = #tpu.dot_dimension_numbers<[1], [0], [0], [1], [0, 0, 1, 1], [], []>} : vector<32x2xf32>, vector<2x32xf32>, vector<32x32xf32> -> vector<32x32xf32>
    %57 = arith.mulf %19, %55 : vector<32x32xf32>
    %58 = arith.addf %57, %56 : vector<32x32xf32>
    %cst_23 = arith.constant 0.000000e+00 : f32
    %59 = vector.broadcast %cst_23 : f32 to vector<32x32xf32>
    %60 = arith.maximumf %58, %59 : vector<32x32xf32>
    %c0_24 = arith.constant 0 : index
    %c0_25 = arith.constant 0 : index
    %c0_26 = arith.constant 0 : index
    %61 = vector.load %arg7[%c0_24, %c0_25, %c0_26] : memref<1x32x32xf32, #tpu.memory_space<vmem>>, vector<1x32x32xf32>
    %62 = vector.shape_cast %61 : vector<1x32x32xf32> to vector<32x32xf32>
    %63 = vector.shape_cast %60 : vector<32x32xf32> to vector<1x32x32xf32>
    tpu.vector_store %arg7[%c0_24, %c0_25, %c0_26], %63 {strides = array<i32>} : memref<1x32x32xf32, #tpu.memory_space<vmem>>, vector<1x32x32xf32>,
    return
  }
  func.func @transform_0(%arg0: i32) -> (i32, i32, i32) {
    %c0_i32 = arith.constant 0 : i32
    %c0_i32_0 = arith.constant 0 : i32
    %c0_i32_1 = arith.constant 0 : i32
    return %arg0, %c0_i32, %c0_i32_0 : i32, i32, i32
  }
  func.func @transform_1(%arg0: i32) -> (i32, i32) {
    %c0_i32 = arith.constant 0 : i32
    %c0_i32_0 = arith.constant 0 : i32
    %c0_i32_1 = arith.constant 0 : i32
    return %c0_i32, %c0_i32_0 : i32, i32
  }
  func.func @transform_2(%arg0: i32) -> (i32, i32) {
    %c0_i32 = arith.constant 0 : i32
    %c0_i32_0 = arith.constant 0 : i32
    %c0_i32_1 = arith.constant 0 : i32
    return %c0_i32, %c0_i32_0 : i32, i32
  }
  func.func @transform_3(%arg0: i32) -> (i32, i32) {
    %c0_i32 = arith.constant 0 : i32
    %c0_i32_0 = arith.constant 0 : i32
    %c0_i32_1 = arith.constant 0 : i32
    return %c0_i32, %c0_i32_0 : i32, i32
  }
  func.func @transform_4(%arg0: i32) -> (i32, i32) {
    %c0_i32 = arith.constant 0 : i32
    %c0_i32_0 = arith.constant 0 : i32
    %c0_i32_1 = arith.constant 0 : i32
    return %c0_i32, %c0_i32_0 : i32, i32
  }
  func.func @transform_5(%arg0: i32) -> (i32, i32) {
    %c0_i32 = arith.constant 0 : i32
    %c0_i32_0 = arith.constant 0 : i32
    %c0_i32_1 = arith.constant 0 : i32
    return %c0_i32, %c0_i32_0 : i32, i32
  }
  func.func @transform_6(%arg0: i32) -> (i32, i32, i32) {
    %c0_i32 = arith.constant 0 : i32
    %c0_i32_0 = arith.constant 0 : i32
    %c0_i32_1 = arith.constant 0 : i32
    return %arg0, %c0_i32, %c0_i32_0 : i32, i32, i32
  }
}

</mosaic_0001>

<bundles_post_ra>
// kernel: tpu_custom_call.1
= control target key start
LH: loop header
LB: loop body
LE: loop exit
PB: predicated region body
PF: predicated region fallthrough
CT: control target
= control target key end

     0   :  { %s4320_s0 = inlined_call_operand.vmem [shape: f32[2,4,16], index: 0, kind: input, shape index: {}]   ;;  %s4321_s1 = inlined_call_operand.vmem [shape: f32[32,12], index: 1, kind: input, shape index: {}]   ;;  %s4322_s2 = inlined_call_operand.vmem [shape: f32[32,1], index: 2, kind: input, shape index: {}]   ;;  %s4323_s3 = inlined_call_operand.vmem [shape: f32[32,1], index: 3, kind: input, shape index: {}]   ;;  %s4324_s4 = inlined_call_operand.vmem [shape: f32[32,2], index: 4, kind: input, shape index: {}]   ;;  %s4325_s5 = inlined_call_operand.vmem [shape: f32[2,32], index: 5, kind: input, shape index: {}]   ;;  %s4326_s6 = inlined_call_operand.hbm [shape: f32[1,32,32], index: 6, kind: output, shape index: {}]  }
   0x1   :  { %v24_v0 = vld [vmem:[%s4320_s0] sm:$0xf]  ;;  %v25_v1 = vld [vmem:[%s4320_s0 + $0x4] sm:$0xf] }
   0x2   :  { %v2934_v2 = vpack.i.bf16 %v25_v1, %v24_v0 }
   0x3   :  { %11 = vsyncpa [#allocation3], 0  ;;  %s3037_s25 = smov 1   ;;  %vm30_vm0 = vcmask 7168   ;;  %vm32_vm1 = vcmask 138240   ;;  %v66_v10 = vld [vmem:[%s4321_s1] sm:$0xff]  ;;  %v285_v11 = vlaneseq }
   0x4   :  { %2935 = vrot.lane.b32.xlu0 %v2934_v2, %s3037_s25  ;;  %vm70_vm2 = vcmask 97280   ;;  %s3038_s0 = smov 15   ;;  %s3039_s28 = smov 127   ;;  %v3042_v12 = vmov 0   ;;  %v3043_v13 = vmov 1966171168  }
   0x5   :  { %2850 = vmatprep.mubr.msk.f32.mxu0 %vm70_vm2, %v66_v10  ;;  %s3040_s29 = smov 16   ;;  %s3041_s30 = smov 126   ;;  %2940 = vset.pattern.permute.xlu1 %v3042_v12  ;;  %v283_v14 = vunpack.c.l.s4 %v3043_v13  ;;  %v3098_v15 = vshrl.u32 %v285_v11, 7  ;;  %v1063_v16 = vld [vmem:[%s4322_s2] sm:$0xff]  ;;  %v172_v20 = vld [vmem:[%s4324_s4 + $0x8] sm:$0xff]  ;;  %v173_v23 = vld [vmem:[%s4324_s4 + $0x10] sm:$0xff] }
   0x6   :  { %2939 = vset.pattern.permute.xlu0 %v3042_v12  ;;  %s3044_s7 = smov 14   ;;  %v171_v17 = vld [vmem:[%s4324_s4] sm:$0xff]  ;;  %v1071_v19 = vcombine.high %v1063_v16, %v1063_v16  ;;  %v174_v24 = vld [vmem:[%s4324_s4 + $0x18] sm:$0xff]  ;;  %v1064_v32 = vld [vmem:[%s4322_s2 + $0x8] sm:$0xff]  ;;  %vm44_vm3 = vcmask 130048   ;;  %vm64_vm4 = vcmask 1043456  }
   0x7   :  { %v284_v18 = vunpack.c.0.s8 %v283_v14  ;;  %v3109_v21 = vpack.c.bf16 %v172_v20, %v171_v17  ;;  %v3121_v25 = vpack.c.bf16 %v174_v24, %v173_v23  ;;  %v1120_v40 = vcombine.high %v1064_v32, %v1064_v32  ;;  %v1267_v47 = vld [vmem:[%s4323_s3] sm:$0xff]  ;;  %v1268_v61 = vld [vmem:[%s4323_s3 + $0x8] sm:$0xff]  ;;  %v1065_v12 = vld [vmem:[%s4322_s2 + $0x10] sm:$0xff] }
   0x8   :  { %v1275_v54 = vcombine.high %v1267_v47, %v1267_v47  ;;  %v1169_v20 = vcombine.high %v1065_v12, %v1065_v12  ;;  %vm3045_vm5 = vmmov 1   ;;  %vm179_vm7 = vcmask 261120  }
   0x9   :  { %v3112_v22 = vsub.s32 %v284_v18, %v3098_v15  ;;  %2907 = vmatprep.subr.bf16.mxu1 %v3109_v21  ;;  %vm2901_vm6 = vmpackc.low %vm64_vm4, %vm3045_vm5  ;;  %vm2349_vm8 = vcmask 1041408   ;;  %vm2340_vm9 = vcmask 15360  }
   0xa   :  { %2909 = vmatpush3.bf16.msra.mxu1 %v3109_v21 }
   0xb   :  { %4412 = vst [vmem:[#allocation5_spill] sm:$0xff] %v3112_v22  ;;  %v1078_v26 = vrot.slane %v1063_v16, %v3112_v22  ;;  %v1085_v27 = vrot.slane %v1071_v19, %v3112_v22  ;;  %2911 = vmatprep.subr.bf16.mxu1 %v3121_v25  ;;  %v1127_v36 = vrot.slane %v1064_v32, %v3112_v22 }
   0xc   :  { %v1134_v43 = vrot.slane %v1120_v40, %v3112_v22  ;;  %v1282_v50 = vrot.slane %v1267_v47, %v3112_v22  ;;  %v1289_v57 = vrot.slane %v1275_v54, %v3112_v22  ;;  %v1331_v0 = vrot.slane %v1268_v61, %v3112_v22 }
   0xd   :  { %v1086_v28 = vcombine.high %v1078_v26, %v1078_v26  ;;  %v1094_v29 = vrot.slane %v1078_v26, %v3112_v22  ;;  %v1087_v31 = vcombine.high %v1085_v27, %v1085_v27  ;;  %v1101_v37 = vrot.slane %v1085_v27, %v3112_v22 }
   0xe   :  { %2913 = vmatpush3.bf16.msra.mxu1 %v3121_v25  ;;  %v1135_v39 = vcombine.high %v1127_v36, %v1127_v36  ;;  %v1143_v44 = vrot.slane %v1127_v36, %v3112_v22  ;;  %v1136_v46 = vcombine.high %v1134_v43, %v1134_v43  ;;  %v1150_v51 = vrot.slane %v1134_v43, %v3112_v22 }
   0xf   :  { %v1108_v30 = vrot.slane %v1086_v28, %v3112_v22  ;;  %v1116_v33 = vcombine.high %v1094_v29, %v1094_v29  ;;  %v1115_v35 = vrot.slane %v1087_v31, %v3112_v22  ;;  %v1117_v41 = vcombine.high %v1101_v37, %v1101_v37 }
  0x10   :  { %v1157_v42 = vrot.slane %v1135_v39, %v3112_v22  ;;  %v1165_v48 = vcombine.high %v1143_v44, %v1143_v44  ;;  %v1164_v49 = vrot.slane %v1136_v46, %v3112_v22  ;;  %v1290_v53 = vcombine.high %v1282_v50, %v1282_v50 }
  0x11   :  { %v1118_v34 = vcombine.high %v1108_v30, %v1108_v30  ;;  %v1119_v38 = vcombine.high %v1115_v35, %v1115_v35  ;;  %v1166_v55 = vcombine.high %v1150_v51, %v1150_v51  ;;  %v1298_v58 = vrot.slane %v1282_v50, %v3112_v22 }
  0x12   :  { %v1167_v45 = vcombine.high %v1157_v42, %v1157_v42  ;;  %v1168_v52 = vcombine.high %v1164_v49, %v1164_v49  ;;  %v1312_v56 = vrot.slane %v1290_v53, %v3112_v22  ;;  %v1291_v60 = vcombine.high %v1289_v57, %v1289_v57 }
  0x13   :  { %v1320_v62 = vcombine.high %v1298_v58, %v1298_v58  ;;  %v1305_v1 = vrot.slane %v1289_v57, %v3112_v22  ;;  %v1176_v16 = vrot.slane %v1065_v12, %v3112_v22  ;;  %v1183_v26 = vrot.slane %v1169_v20, %v3112_v22 }
  0x14   :  { %v1322_v59 = vcombine.high %v1312_v56, %v1312_v56  ;;  %v1319_v63 = vrot.slane %v1291_v60, %v3112_v22 }
  0x15   :  { %v1184_v19 = vcombine.high %v1176_v16, %v1176_v16  ;;  %v1192_v27 = vrot.slane %v1176_v16, %v3112_v22 }
  0x16   :  { %v1323_v2 = vcombine.high %v1319_v63, %v1319_v63 }
  0x17   :  { %v1206_v24 = vrot.slane %v1184_v19, %v3112_v22  ;;  %v1214_v31 = vcombine.high %v1192_v27, %v1192_v27  ;;  %v68_v19 = vld [vmem:[%s4321_s1 + $0x10] sm:$0xff] }
  0x19   :  { %v1216_v28 = vcombine.high %v1206_v24, %v1206_v24 }
  0x76   :  { %v2936_v3 = vpop.permute.xlu0 %2935 }
  0x77   :  { %v2938_v4 = vunpack.i.h.bf16 %v2936_v3  ;;  %v2937_v5 = vunpack.i.l.bf16 %v2936_v3  ;;  %v1339_v3 = vcombine.high %v1331_v0, %v1331_v0 }
  0x79   :  { %v38_v6 = vsel %vm30_vm0, 0.0, %v2938_v4  ;;  %v31_v7 = vsel %vm30_vm0, 0.0, %v2937_v5  ;;  %v1324_v4 = vcombine.high %v1268_v61, %v1268_v61  ;;  %v1321_v5 = vcombine.high %v1305_v1, %v1305_v1 }
  0x7a   :  { %v39_v8 = vsel %vm32_vm1, %v38_v6, 0.0  ;;  %v3090_v9 = vsel %vm32_vm1, %v31_v7, 0.0  ;;  %v1361_v6 = vrot.slane %v1339_v3, %v3112_v22 }
  0x7b   :  { %50 = vrot.lane.b32.xlu1 %v39_v8, %s3038_s0  ;;  %47 = vrot.lane.b32.xlu0 %v3090_v9, %s3039_s28  ;;  %v1338_v7 = vrot.slane %v1324_v4, %v3112_v22 }
  0x7c   :  { %v1371_v10 = vcombine.high %v1361_v6, %v1361_v6 }
  0x7d   :  { %v1340_v11 = vcombine.high %v1338_v7, %v1338_v7  ;;  %v1354_v17 = vrot.slane %v1338_v7, %v3112_v22 }
  0x7f   :  { %41 = vrot.lane.b32.xlu1 %v39_v8, %s3040_s29  ;;  %54 = vrot.lane.b32.xlu0 %v3090_v9, %s3041_s30  ;;  %v1368_v14 = vrot.slane %v1340_v11, %v3112_v22  ;;  %v1370_v23 = vcombine.high %v1354_v17, %v1354_v17 }
  0x81   :  { %v1372_v18 = vcombine.high %v1368_v14, %v1368_v14 }
  0x83   :  { %57 = vrot.lane.b32.xlu1 %v39_v8, %s3044_s7  ;;  %1472 = vperm.xlu0 %2939, %v1094_v29   ;;  %v1347_v8 = vrot.slane %v1331_v0, %v3112_v22  ;;  %v1185_v29 = vcombine.high %v1183_v26, %v1183_v26 }
  0x85   :  { %v1369_v13 = vcombine.high %v1347_v8, %v1347_v8  ;;  %v1213_v32 = vrot.slane %v1185_v29, %v3112_v22 }
  0x87   :  { %1480 = vperm.xlu1 %2940, %v1108_v30   ;;  %1496 = vperm.xlu0 %2939, %v1118_v34   ;;  %v1066_v30 = vld [vmem:[%s4322_s2 + $0x18] sm:$0xff]  ;;  %v1199_v34 = vrot.slane %v1183_v26, %v3112_v22 }
  0x8b   :  { %1488 = vperm.xlu1 %2940, %v1116_v33   ;;  %1512 = vperm.xlu0 %2939, %v1115_v35   ;;  %v1225_v33 = vrot.slane %v1066_v30, %v3112_v22  ;;  %v1217_v35 = vcombine.high %v1213_v32, %v1213_v32 }
  0x8d   :  { %v1233_v36 = vcombine.high %v1225_v33, %v1225_v33 }
  0x8f   :  { %1504 = vperm.xlu1 %2940, %v1101_v37   ;;  %1528 = vperm.xlu0 %2939, %v1119_v38   ;;  %v1218_v37 = vcombine.high %v1066_v30, %v1066_v30  ;;  %v1215_v38 = vcombine.high %v1199_v34, %v1199_v34  ;;  %v1255_v39 = vrot.slane %v1233_v36, %v3112_v22 }
  0x91   :  { %v1232_v40 = vrot.slane %v1218_v37, %v3112_v22 }
  0x93   :  { %1520 = vperm.xlu1 %2940, %v1117_v41   ;;  %1544 = vperm.xlu0 %2939, %v1157_v42   ;;  %v1241_v41 = vrot.slane %v1225_v33, %v3112_v22  ;;  %v1265_v42 = vcombine.high %v1255_v39, %v1255_v39  ;;  %v1234_v43 = vcombine.high %v1232_v40, %v1232_v40 }
  0x95   :  { %v1262_v46 = vrot.slane %v1234_v43, %v3112_v22 }
  0x97   :  { %1536 = vperm.xlu1 %2940, %v1143_v44   ;;  %1560 = vperm.xlu0 %2939, %v1167_v45   ;;  %v1269_v44 = vld [vmem:[%s4323_s3 + $0x10] sm:$0xff]  ;;  %v1263_v45 = vcombine.high %v1241_v41, %v1241_v41 }
  0x98   :  { %v1380_v47 = vrot.slane %v1269_v44, %v3112_v22 }
  0x9a   :  { %v1388_v50 = vcombine.high %v1380_v47, %v1380_v47 }
  0x9b   :  { %1552 = vperm.xlu1 %2940, %v1165_v48   ;;  %1576 = vperm.xlu0 %2939, %v1164_v49   ;;  %v1248_v48 = vrot.slane %v1232_v40, %v3112_v22  ;;  %v1266_v49 = vcombine.high %v1262_v46, %v1262_v46 }
  0x9c   :  { %v1410_v53 = vrot.slane %v1388_v50, %v3112_v22 }
  0x9f   :  { %1568 = vperm.xlu1 %2940, %v1150_v51   ;;  %1592 = vperm.xlu0 %2939, %v1168_v52   ;;  %v1373_v51 = vcombine.high %v1269_v44, %v1269_v44  ;;  %v1264_v52 = vcombine.high %v1248_v48, %v1248_v48 }
  0xa1   :  { %v1387_v54 = vrot.slane %v1373_v51, %v3112_v22 }
  0xa3   :  { %1584 = vperm.xlu1 %2940, %v1166_v55   ;;  %1832 = vperm.xlu0 %2939, %v1312_v56   ;;  %v1396_v55 = vrot.slane %v1380_v47, %v3112_v22  ;;  %v1420_v56 = vcombine.high %v1410_v53, %v1410_v53  ;;  %v1389_v57 = vcombine.high %v1387_v54, %v1387_v54 }
  0xa5   :  { %v1418_v61 = vcombine.high %v1396_v55, %v1396_v55 }
  0xa7   :  { %1824 = vperm.xlu1 %2940, %v1298_v58   ;;  %1848 = vperm.xlu0 %2939, %v1322_v59   ;;  %v1270_v59 = vld [vmem:[%s4323_s3 + $0x18] sm:$0xff] }
  0xa8   :  { %v1422_v7 = vcombine.high %v1270_v59, %v1270_v59 }
  0xab   :  { %1840 = vperm.xlu1 %2940, %v1320_v62   ;;  %1864 = vperm.xlu0 %2939, %v1319_v63   ;;  %v1417_v62 = vrot.slane %v1389_v57, %v3112_v22  ;;  %v1429_v63 = vrot.slane %v1270_v59, %v3112_v22 }
  0xaf   :  { %1856 = vperm.xlu1 %2940, %v1305_v1   ;;  %1880 = vperm.xlu0 %2939, %v1323_v2   ;;  %v1403_v2 = vrot.slane %v1387_v54, %v3112_v22 }
  0xb3   :  { %1872 = vperm.xlu1 %2940, %v1321_v5   ;;  %1896 = vperm.xlu0 %2939, %v1361_v6   ;;  %v1421_v5 = vcombine.high %v1417_v62, %v1417_v62  ;;  %v1437_v6 = vcombine.high %v1429_v63, %v1429_v63 }
  0xb5   :  { %v1459_v16 = vrot.slane %v1437_v6, %v3112_v22 }
  0xb7   :  { %1888 = vperm.xlu1 %2940, %v1347_v8   ;;  %1912 = vperm.xlu0 %2939, %v1371_v10   ;;  %v1469_v20 = vcombine.high %v1459_v16, %v1459_v16 }
  0xbb   :  { %1904 = vperm.xlu1 %2940, %v1369_v13   ;;  %1928 = vperm.xlu0 %2939, %v1368_v14   ;;  %v1419_v13 = vcombine.high %v1403_v2, %v1403_v2 }
  0xbf   :  { %1920 = vperm.xlu1 %2940, %v1354_v17   ;;  %1944 = vperm.xlu0 %2939, %v1372_v18   ;;  %v67_v17 = vld [vmem:[%s4321_s1 + $0x8] sm:$0xff]  ;;  %v1445_v18 = vrot.slane %v1429_v63, %v3112_v22 }
  0xc1   :  { %v1467_v26 = vcombine.high %v1445_v18, %v1445_v18 }
  0xc3   :  { %1936 = vperm.xlu1 %2940, %v1370_v23   ;;  %1608 = vperm.xlu0 %2939, %v1206_v24   ;;  %v69_v24 = vld [vmem:[%s4321_s1 + $0x18] sm:$0xff] }
  0xc7   :  { %1600 = vperm.xlu1 %2940, %v1192_v27   ;;  %1624 = vperm.xlu0 %2939, %v1216_v28  }
  0xcb   :  { %1616 = vperm.xlu1 %2940, %v1214_v31   ;;  %1640 = vperm.xlu0 %2939, %v1213_v32  }
  0xcf   :  { %1632 = vperm.xlu1 %2940, %v1199_v34   ;;  %1656 = vperm.xlu0 %2939, %v1217_v35  }
  0xd3   :  { %1648 = vperm.xlu1 %2940, %v1215_v38   ;;  %1672 = vperm.xlu0 %2939, %v1255_v39  }
  0xd7   :  { %1664 = vperm.xlu1 %2940, %v1241_v41   ;;  %1688 = vperm.xlu0 %2939, %v1265_v42  }
  0xdb   :  { %1680 = vperm.xlu1 %2940, %v1263_v45   ;;  %1704 = vperm.xlu0 %2939, %v1262_v46  }
  0xdf   :  { %1696 = vperm.xlu1 %2940, %v1248_v48   ;;  %1720 = vperm.xlu0 %2939, %v1266_v49  }
  0xe3   :  { %1712 = vperm.xlu1 %2940, %v1264_v52   ;;  %1960 = vperm.xlu0 %2939, %v1410_v53  }
  0xe7   :  { %1952 = vperm.xlu1 %2940, %v1396_v55   ;;  %1976 = vperm.xlu0 %2939, %v1420_v56  }
  0xeb   :  { %1968 = vperm.xlu1 %2940, %v1418_v61   ;;  %1992 = vperm.xlu0 %2939, %v1417_v62  }
  0xed   :  { %v51_v58 = vpop.permute.xlu1 %50  ;;  %v48_v60 = vpop.permute.xlu0 %47 }
  0xee   :  { %v53_v0 = vsel %vm44_vm3, %v48_v60, %v51_v58 }
  0xef   :  { %v62_v4 = vrot.slane %v53_v0, 4  ;;  %1984 = vperm.xlu1 %2940, %v1403_v2   ;;  %2008 = vperm.xlu0 %2939, %v1421_v5  }
  0xf1   :  { %v42_v1 = vpop.permute.xlu1 %41  ;;  %v55_v8 = vpop.permute.xlu0 %54 }
  0xf2   :  { %v45_v3 = vsel %vm44_vm3, %v3090_v9, %v42_v1  ;;  %v1436_v9 = vrot.slane %v1422_v7, %v3112_v22 }
  0xf3   :  { %v65_v12 = vsel %vm64_vm4, %v45_v3, %v62_v4  ;;  %2000 = vperm.xlu1 %2940, %v1419_v13   ;;  %2024 = vperm.xlu0 %2939, %v1459_v16  }
  0xf4   :  { %v1438_v23 = vcombine.high %v1436_v9, %v1436_v9  ;;  %v1452_v28 = vrot.slane %v1436_v9, %v3112_v22 }
  0xf5   :  { %v58_v10 = vpop.permute.xlu1 %57 }
  0xf6   :  { %v60_v11 = vsel %vm44_vm3, %v55_v8, %v58_v10  ;;  %v1466_v27 = vrot.slane %v1438_v23, %v3112_v22  ;;  %v1468_v29 = vcombine.high %v1452_v28, %v1452_v28 }
  0xf7   :  { %v2900_v14 = vpack.c.bf16 %v60_v11, %v65_v12  ;;  %2016 = vperm.xlu1 %2940, %v1445_v18   ;;  %2040 = vperm.xlu0 %2939, %v1469_v20  }
  0xf8   :  { %v1470_v30 = vcombine.high %v1466_v27, %v1466_v27 }
  0xf9   :  { %2902 = vmatprep.subr.msk.bf16.mxu0 %vm2901_vm6, %v2900_v14 }
  0xfa   :  { %2905 = vmatpush3.bf16.msk.msra.mxu0 %vm2901_vm6, %v2900_v14 }
  0xfb   :  { %2915 = vmatprep.subr.bf16.mxu0 %v3109_v21  ;;  %2032 = vperm.xlu1 %2940, %v1467_v26  }
  0xfc   :  { %2056 = vperm.xlu0 %2939, %v1466_v27  }
  0xfd   :  { %2851 = vmatmul.mubr.msk.f32.vlgmr.msra.gmra.mrb[0].mxu0 %vm70_vm2, %v67_v17 }
  0xfe   :  { %2853 = vmatprep.mubr.msk.f32.mxu0 %vm70_vm2, %v68_v19  ;;  %2917 = vmatpush3.bf16.msra.mxu0 %v3109_v21 }
  0xff   :  { %2919 = vmatprep.subr.bf16.mxu0 %v3121_v25  ;;  %2048 = vperm.xlu1 %2940, %v1452_v28  }
 0x100   :  { %2072 = vperm.xlu0 %2939, %v1470_v30  }
 0x101   :  { %2854 = vmatmul.mubr.msk.f32.gmra.mrb[2].mxu0 %vm70_vm2, %v69_v24 }
 0x102   :  { %2921 = vmatpush3.bf16.msra.mxu0 %v3121_v25  ;;  %v3245_v38 = vpop.permute.xlu0 %1472 }
 0x103   :  { %2064 = vperm.xlu1 %2940, %v1468_v29  }
 0x106   :  { %v3243_v37 = vpop.permute.xlu1 %1480  ;;  %v3249_v40 = vpop.permute.xlu0 %1496 }
 0x10a   :  { %v3247_v39 = vpop.permute.xlu1 %1488  ;;  %v3253_v42 = vpop.permute.xlu0 %1512 }
 0x10e   :  { %v3251_v41 = vpop.permute.xlu1 %1504  ;;  %v3257_v44 = vpop.permute.xlu0 %1528 }
 0x112   :  { %v3255_v43 = vpop.permute.xlu1 %1520  ;;  %v3261_v46 = vpop.permute.xlu0 %1544 }
 0x116   :  { %v3259_v45 = vpop.permute.xlu1 %1536  ;;  %v3265_v48 = vpop.permute.xlu0 %1560 }
 0x11a   :  { %v3263_v47 = vpop.permute.xlu1 %1552  ;;  %v3269_v50 = vpop.permute.xlu0 %1576 }
 0x11e   :  { %v3267_v49 = vpop.permute.xlu1 %1568  ;;  %v3273_v52 = vpop.permute.xlu0 %1592 }
 0x122   :  { %v3271_v51 = vpop.permute.xlu1 %1584  ;;  %v3277_v54 = vpop.permute.xlu0 %1832 }
 0x123   :  { %4418 = vst [vmem:[#allocation11_spill] sm:$0xff] %v3277_v54 }
 0x126   :  { %v3275_v53 = vpop.permute.xlu1 %1824  ;;  %v3281_v56 = vpop.permute.xlu0 %1848 }
 0x127   :  { %4417 = vst [vmem:[#allocation10_spill] sm:$0xff] %v3275_v53  ;;  %4420 = vst [vmem:[#allocation13_spill] sm:$0xff] %v3281_v56 }
 0x12a   :  { %v3279_v55 = vpop.permute.xlu1 %1840  ;;  %v3285_v58 = vpop.permute.xlu0 %1864 }
 0x12b   :  { %4419 = vst [vmem:[#allocation12_spill] sm:$0xff] %v3279_v55  ;;  %4422 = vst [vmem:[#allocation15_spill] sm:$0xff] %v3285_v58 }
 0x12e   :  { %v3283_v57 = vpop.permute.xlu1 %1856  ;;  %v3289_v60 = vpop.permute.xlu0 %1880 }
 0x12f   :  { %4421 = vst [vmem:[#allocation14_spill] sm:$0xff] %v3283_v57  ;;  %4424 = vst [vmem:[#allocation17_spill] sm:$0xff] %v3289_v60 }
 0x132   :  { %v3287_v59 = vpop.permute.xlu1 %1872  ;;  %v3293_v62 = vpop.permute.xlu0 %1896 }
 0x133   :  { %4423 = vst [vmem:[#allocation16_spill] sm:$0xff] %v3287_v59 }
 0x136   :  { %v3291_v61 = vpop.permute.xlu1 %1888  ;;  %v3297_v0 = vpop.permute.xlu0 %1912 }
 0x13a   :  { %v3295_v63 = vpop.permute.xlu1 %1904  ;;  %v3301_v2 = vpop.permute.xlu0 %1928 }
 0x13b   :  { %4426 = vst [vmem:[#allocation19_spill] sm:$0xff] %v3301_v2 }
 0x13e   :  { %v3299_v1 = vpop.permute.xlu1 %1920  ;;  %v3305_v4 = vpop.permute.xlu0 %1944 }
 0x13f   :  { %4425 = vst [vmem:[#allocation18_spill] sm:$0xff] %v3299_v1  ;;  %4428 = vst [vmem:[#allocation21_spill] sm:$0xff] %v3305_v4 }
 0x142   :  { %v3303_v3 = vpop.permute.xlu1 %1936  ;;  %v3309_v6 = vpop.permute.xlu0 %1608 }
 0x143   :  { %4427 = vst [vmem:[#allocation20_spill] sm:$0xff] %v3303_v3 }
 0x146   :  { %v3307_v5 = vpop.permute.xlu1 %1600  ;;  %v3313_v8 = vpop.permute.xlu0 %1624 }
 0x14a   :  { %v3311_v7 = vpop.permute.xlu1 %1616  ;;  %v3317_v11 = vpop.permute.xlu0 %1640 }
 0x14e   :  { %v3315_v10 = vpop.permute.xlu1 %1632  ;;  %v3321_v13 = vpop.permute.xlu0 %1656 }
 0x152   :  { %v3319_v12 = vpop.permute.xlu1 %1648  ;;  %v3325_v16 = vpop.permute.xlu0 %1672 }
 0x156   :  { %v3323_v14 = vpop.permute.xlu1 %1664  ;;  %v3329_v17 = vpop.permute.xlu0 %1688 }
 0x15a   :  { %v3327_v9 = vpop.permute.xlu1 %1680  ;;  %v3333_v19 = vpop.permute.xlu0 %1704 }
 0x15e   :  { %v3331_v18 = vpop.permute.xlu1 %1696  ;;  %v3337_v23 = vpop.permute.xlu0 %1720 }
 0x162   :  { %v3335_v20 = vpop.permute.xlu1 %1712  ;;  %v3341_v26 = vpop.permute.xlu0 %1960 }
 0x163   :  { %4430 = vst [vmem:[#allocation23_spill] sm:$0xff] %v3341_v26 }
 0x166   :  { %v3339_v24 = vpop.permute.xlu1 %1952  ;;  %v3345_v28 = vpop.permute.xlu0 %1976 }
 0x167   :  { %4429 = vst [vmem:[#allocation22_spill] sm:$0xff] %v3339_v24  ;;  %4432 = vst [vmem:[#allocation25_spill] sm:$0xff] %v3345_v28 }
 0x16a   :  { %v3343_v27 = vpop.permute.xlu1 %1968  ;;  %v3349_v30 = vpop.permute.xlu0 %1992 }
 0x16b   :  { %4431 = vst [vmem:[#allocation24_spill] sm:$0xff] %v3343_v27  ;;  %4434 = vst [vmem:[#allocation27_spill] sm:$0xff] %v3349_v30  ;;  %v4470_v30 = vld [vmem:[#allocation5_spill] sm:$0xff] }
 0x16e   :  { %v3347_v29 = vpop.permute.xlu1 %1984 }
 0x16f   :  { %4433 = vst [vmem:[#allocation26_spill] sm:$0xff] %v3347_v29 }
 0x1d0   :  { %v3215_v21 = vpop.f32.mrb[0].mxu0 }
 0x1d1   :  { %4413 = vst [vmem:[#allocation6_spill] sm:$0xff] %v3215_v21  ;;  %v3217_v31 = vpop.f32.mrb[1].mxu0  ;;  %v176_v25 = vmul.f32 %v3215_v21, %v3215_v21 }
 0x1d2   :  { %4414 = vst [vmem:[#allocation7_spill] sm:$0xff] %v3217_v31  ;;  %v175_v32 = vmul.f32 %v3217_v31, %v3217_v31  ;;  %2864 = vmatprep.mubr.msk.f32.mxu1 %vm179_vm7, %v3217_v31 }
 0x1d3   :  { %2865 = vmatmul.mubr.msk.f32.vlgmr.msra.gmra.mrb[0].mxu1 %vm179_vm7, %v3215_v21 }
 0x1d4   :  { %v3227_v33 = vpop.f32.mrb[2].mxu0  ;;  %2878 = vmatprep.mubr.msk.f32.mxu0 %vm179_vm7, %v175_v32  ;;  %v3351_v32 = vpop.permute.xlu1 %2000 }
 0x1d5   :  { %4415 = vst [vmem:[#allocation8_spill] sm:$0xff] %v3227_v33  ;;  %v3230_v34 = vpop.f32.mrb[3].mxu0  ;;  %2879 = vmatmul.mubr.msk.f32.vlgmr.msra.gmra.mrb[4].mxu0 %vm179_vm7, %v176_v25  ;;  %v178_v36 = vmul.f32 %v3227_v33, %v3227_v33  ;;  %4435 = vst [vmem:[#allocation28_spill] sm:$0xff] %v3351_v32  ;;  %v3353_v25 = vpop.permute.xlu0 %2008 }
 0x1d6   :  { %4416 = vst [vmem:[#allocation9_spill] sm:$0xff] %v3230_v34  ;;  %v177_v35 = vmul.f32 %v3230_v34, %v3230_v34  ;;  %2867 = vmatprep.mubr.msk.f32.mxu1 %vm179_vm7, %v3230_v34  ;;  %4436 = vst [vmem:[#allocation29_spill] sm:$0xff] %v3353_v25 }
 0x1d7   :  { %2868 = vmatmul.mubr.msk.f32.gmra.mrb[2].mxu1 %vm179_vm7, %v3227_v33  ;;  %v3363_v33 = vsub.s32 0, %v3098_v15 }
 0x1d8   :  { %2881 = vmatprep.mubr.msk.f32.mxu0 %vm179_vm7, %v177_v35  ;;  %v2111_v35 = vld [vmem:[%s4325_s5] sm:$0x3]  ;;  %s3046_s5 = smov [#allocation2]  }
 0x1d9   :  { %2882 = vmatmul.mubr.msk.f32.gmra.mrb[6].mxu0 %vm179_vm7, %v178_v36  ;;  %2884 = vmatprep.subr.msk.mxu1 %vm2349_vm8, %v2111_v35  ;;  %v3358_v36 = vpop.permute.xlu1 %2016  ;;  %v3360_v34 = vpop.permute.xlu0 %2024  ;;  %4439 = vst [vmem:[#allocation32_spill] sm:$0xff] %v3363_v33  ;;  %v3367_v31 = vrot.slane %v3243_v37, %v3363_v33  ;;  %v3371_v21 = vrot.slane %v3245_v38, %v3363_v33  ;;  %s2780_s11 = sshll.u32 %s3046_s5, 4  ;;  %s2781_s11 = int_to_ptr.vmem [resolvable:$true] %s2780_s11 }
 0x1da   :  { %2892 = vmatprep.subr.msk.mxu0 %vm2349_vm8, %v2111_v35  ;;  %2885 = vmatpush3.msk.msra.mxu1 %vm2349_vm8, %v2111_v35  ;;  %4437 = vst [vmem:[#allocation30_spill] sm:$0xff] %v3358_v36  ;;  %4438 = vst [vmem:[#allocation31_spill] sm:$0xff] %v3360_v34  ;;  %v3375_v22 = vrot.slane %v3247_v39, %v3363_v33  ;;  %v3383_v15 = vrot.slane %v3251_v41, %v3363_v33  ;;  %s3013_s12 = scalar_lea.vmem %s2781_s11, 512  ;;  %p3018_p1 = scmp.lt.s32.totalorder %s2781_s11, %s2781_s11 }
 0x1db   :  { %2893 = vmatpush3.msk.msra.mxu0 %vm2349_vm8, %v2111_v35  ;;  %4440 = vst [vmem:[#allocation33_spill] sm:$0xff] %v3367_v31  ;;  %4441 = vst [vmem:[#allocation34_spill] sm:$0xff] %v3371_v21  ;;  %v3379_v35 = vrot.slane %v3249_v40, %v3363_v33  ;;  %v3387_v37 = vrot.slane %v3253_v42, %v3363_v33  ;;  %v3391_v38 = vrot.slane %v3255_v43, %v3363_v33  ;;  %p3014_p0 = scmp.ne.s32.totalorder %s2781_s11, %s3013_s12  ;;  %p3019_p2 = scmp.lt.s32.totalorder %s3013_s12, %s3013_s12 }
 0x1dc   :  { %4442 = vst [vmem:[#allocation35_spill] sm:$0xff] %v3375_v22  ;;  %4444 = vst [vmem:[#allocation37_spill] sm:$0xff] %v3383_v15  ;;  %v3395_v39 = vrot.slane %v3257_v44, %v3363_v33  ;;  %v3403_v41 = vrot.slane %v3259_v45, %v3363_v33  ;;  %v3407_v42 = vrot.slane %v3261_v46, %v3363_v33 }
 0x1dd   :  { %4443 = vst [vmem:[#allocation36_spill] sm:$0xff] %v3379_v35  ;;  %4445 = vst [vmem:[#allocation38_spill] sm:$0xff] %v3387_v37  ;;  %v3397_v22 = vpop.permute.xlu1 %2032  ;;  %v3399_v40 = vpop.permute.xlu0 %2040  ;;  %v3411_v43 = vrot.slane %v3263_v47, %v3363_v33  ;;  %v3415_v44 = vrot.slane %v3265_v48, %v3363_v33  ;;  %v3423_v45 = vrot.slane %v3269_v50, %v3363_v33  ;;  %p3020_p3 = por %p3019_p2, %p3018_p1 }
 0x1de   :  { %4446 = vst [vmem:[#allocation39_spill] sm:$0xff] %v3391_v38  ;;  %4447 = vst [vmem:[#allocation40_spill] sm:$0xff] %v3395_v39  ;;  %v3419_v39 = vrot.slane %v3267_v49, %v3363_v33  ;;  %v3427_v46 = vrot.slane %v3271_v51, %v3363_v33  ;;  %v3431_v47 = vrot.slane %v3273_v52, %v3363_v33 }
 0x1df   :  { %4448 = vst [vmem:[#allocation41_spill] sm:$0xff] %v3397_v22  ;;  %4449 = vst [vmem:[#allocation42_spill] sm:$0xff] %v3399_v40  ;;  %v3471_v50 = vrot.slane %v3307_v5, %v3363_v33  ;;  %v3475_v37 = vrot.slane %v3309_v6, %v3363_v33  ;;  %v3479_v52 = vrot.slane %v3311_v7, %v3363_v33  ;;  %p3021_p4 = pnand %p3020_p3, %p3014_p0 }
 0x1e0   :  { %v3483_v48 = vrot.slane %v3313_v8, %v3363_v33  ;;  %v3487_v38 = vrot.slane %v3315_v10, %v3363_v33  ;;  %v3491_v5 = vrot.slane %v3317_v11, %v3363_v33  ;;  %v3495_v6 = vrot.slane %v3319_v12, %v3363_v33 }
 0x1e1   :  { %v3465_v60 = vpop.permute.xlu1 %2048  ;;  %v3467_v49 = vpop.permute.xlu0 %2056  ;;  %4452 = vst [vmem:[#allocation45_spill] sm:$0xff] %v3471_v50  ;;  %4453 = vst [vmem:[#allocation46_spill] sm:$0xff] %v3475_v37  ;;  %v3499_v7 = vrot.slane %v3321_v13, %v3363_v33  ;;  %v3503_v8 = vrot.slane %v3323_v14, %v3363_v33  ;;  %v3507_v10 = vrot.slane %v3325_v16, %v3363_v33 }
 0x1e2   :  { %4450 = vst [vmem:[#allocation43_spill] sm:$0xff] %v3465_v60  ;;  %4451 = vst [vmem:[#allocation44_spill] sm:$0xff] %v3467_v49  ;;  %v3511_v11 = vrot.slane %v3327_v9, %v3363_v33  ;;  %v3515_v12 = vrot.slane %v3329_v17, %v3363_v33  ;;  %v3519_v13 = vrot.slane %v3331_v18, %v3363_v33 }
 0x1e3   :  { %4454 = vst [vmem:[#allocation47_spill] sm:$0xff] %v3479_v52  ;;  %4455 = vst [vmem:[#allocation48_spill] sm:$0xff] %v3483_v48  ;;  %v3523_v14 = vrot.slane %v3333_v19, %v3363_v33  ;;  %v3527_v16 = vrot.slane %v3335_v20, %v3363_v33  ;;  %v3531_v9 = vrot.slane %v3337_v23, %v3363_v33 }
 0x1e4   :  { %4456 = vst [vmem:[#allocation49_spill] sm:$0xff] %v3487_v38  ;;  %4457 = vst [vmem:[#allocation50_spill] sm:$0xff] %v3491_v5 }
 0x1e5   :  { %4458 = vst [vmem:[#allocation51_spill] sm:$0xff] %v3495_v6  ;;  %4459 = vst [vmem:[#allocation52_spill] sm:$0xff] %v3499_v7  ;;  %v3549_v24 = vpop.permute.xlu1 %2064  ;;  %v3551_v51 = vpop.permute.xlu0 %2072 }
 0x1e6   :  { %4460 = vst [vmem:[#allocation53_spill] sm:$0xff] %v3503_v8  ;;  %4461 = vst [vmem:[#allocation54_spill] sm:$0xff] %v3507_v10 }
 0x1e7   :  { %4462 = vst [vmem:[#allocation55_spill] sm:$0xff] %v3511_v11  ;;  %4463 = vst [vmem:[#allocation56_spill] sm:$0xff] %v3515_v12 }
 0x1e8   :  { %4464 = vst [vmem:[#allocation57_spill] sm:$0xff] %v3519_v13  ;;  %4465 = vst [vmem:[#allocation58_spill] sm:$0xff] %v3523_v14 }
 0x1e9   :  { %4466 = vst [vmem:[#allocation59_spill] sm:$0xff] %v3527_v16  ;;  %4467 = vst [vmem:[#allocation60_spill] sm:$0xff] %v3531_v9 }
 0x1ea   :  { %4468 = vst [vmem:[#allocation61_spill] sm:$0xff] %v3549_v24  ;;  %4469 = vst [vmem:[#allocation62_spill] sm:$0xff] %v3551_v51 }
 0x2a6   :  { %v2866_v23 = vpop.f32.mrb[0].mxu1 }
 0x2a7   :  { %v330_v32 = vcombine.high %v2866_v23, %v2866_v23  ;;  %v337_v29 = vrot.slane %v2866_v23, %v4470_v30  ;;  %v258_v18 = vpop.f32.mrb[1].mxu1 }
 0x2a8   :  { %v281_v22 = vcombine.high %v258_v18, %v258_v18  ;;  %v288_v4 = vrot.slane %v258_v18, %v4470_v30  ;;  %v3571_v40 = vpop.f32.mrb[4].mxu0 }
 0x2a9   :  { %v344_v17 = vrot.slane %v330_v32, %v4470_v30  ;;  %v345_v60 = vcombine.high %v337_v29, %v337_v29  ;;  %v353_v25 = vrot.slane %v337_v29, %v4470_v30  ;;  %v659_v23 = vcombine.high %v3571_v40, %v3571_v40  ;;  %v3577_v49 = vpop.f32.mrb[5].mxu0 }
 0x2aa   :  { %v295_v19 = vrot.slane %v281_v22, %v4470_v30  ;;  %v296_v24 = vcombine.high %v288_v4, %v288_v4  ;;  %v304_v20 = vrot.slane %v288_v4, %v4470_v30  ;;  %v3583_v18 = vrot.slane %v3571_v40, %v4470_v30  ;;  %v3585_v51 = vpop.f32.mrb[2].mxu1 }
 0x2ab   :  { %v346_v32 = vcombine.high %v344_v17, %v344_v17  ;;  %v360_v34 = vrot.slane %v344_v17, %v4470_v30  ;;  %v367_v29 = vrot.slane %v345_v60, %v4470_v30  ;;  %v375_v36 = vcombine.high %v353_v25, %v353_v25  ;;  %v3589_v28 = vpop.f32.mrb[3].mxu1 }
 0x2ac   :  { %4471 = vst [vmem:[#allocation5_spill] sm:$0xff] %v3589_v28  ;;  %v3591_v27 = vmul.f32 0.0625, %v353_v25  ;;  %v297_v22 = vcombine.high %v295_v19, %v295_v19  ;;  %v311_v26 = vrot.slane %v295_v19, %v4470_v30  ;;  %v318_v4 = vrot.slane %v296_v24, %v4470_v30  ;;  %v3595_v2 = vpop.f32.mrb[6].mxu0 }
 0x2ad   :  { %4472 = vst [vmem:[#allocation63_spill] sm:$0xff] %v3595_v2  ;;  %v374_v40 = vrot.slane %v346_v32, %v4470_v30  ;;  %v376_v9 = vcombine.high %v360_v34, %v360_v34  ;;  %v377_v16 = vcombine.high %v367_v29, %v367_v29  ;;  %v3598_v14 = vmul.f32 0.0625, %v367_v29  ;;  %v3600_v17 = vpop.f32.mrb[7].mxu0 }
 0x2ae   :  { %4473 = vst [vmem:[#allocation64_spill] sm:$0xff] %v3600_v17  ;;  %v3602_v60 = vmul.f32 0.0625, %v375_v36  ;;  %v3604_v13 = vmul.f32 0.0625, %v360_v34  ;;  %v3608_v25 = vmul.f32 %v3591_v27, %v3591_v27  ;;  %v325_v24 = vrot.slane %v297_v22, %v4470_v30 }
 0x2af   :  { %v378_v19 = vcombine.high %v374_v40, %v374_v40  ;;  %v3611_v12 = vmul.f32 0.0625, %v377_v16  ;;  %v3613_v32 = vmul.f32 0.0625, %v374_v40  ;;  %v3615_v11 = vmul.f32 0.0625, %v376_v9 }
 0x2b0   :  { %v3619_v29 = vmul.f32 %v3598_v14, %v3598_v14  ;;  %v3623_v34 = vmul.f32 %v3602_v60, %v3602_v60  ;;  %v3627_v36 = vmul.f32 %v3604_v13, %v3604_v13  ;;  %v326_v22 = vcombine.high %v304_v20, %v304_v20 }
 0x2b1   :  { %v3629_v10 = vmul.f32 0.0625, %v378_v19  ;;  %v3633_v16 = vmul.f32 %v3611_v12, %v3611_v12  ;;  %v3637_v9 = vmul.f32 %v3613_v32, %v3613_v32  ;;  %v3641_v40 = vmul.f32 %v3615_v11, %v3615_v11 }
 0x2b2   :  { %v327_v8 = vcombine.high %v311_v26, %v311_v26  ;;  %v328_v7 = vcombine.high %v318_v4, %v318_v4  ;;  %v329_v6 = vcombine.high %v325_v24, %v325_v24  ;;  %v3643_v59 = vmul.f32 0.0625, %v304_v20 }
 0x2b3   :  { %v3647_v19 = vmul.f32 %v3629_v10, %v3629_v10  ;;  %v3649_v5 = vmul.f32 0.0625, %v318_v4  ;;  %v3651_v58 = vmul.f32 0.0625, %v326_v22  ;;  %v3653_v57 = vmul.f32 0.0625, %v311_v26 }
 0x2b4   :  { %4474 = vst [vmem:[#allocation65_spill] sm:$0xff] %v3643_v59  ;;  %v3655_v56 = vmul.f32 0.0625, %v328_v7  ;;  %v3657_v38 = vmul.f32 0.0625, %v325_v24  ;;  %v3659_v55 = vmul.f32 0.0625, %v327_v8  ;;  %v3661_v54 = vmul.f32 0.0625, %v329_v6 }
 0x2b5   :  { %4475 = vst [vmem:[#allocation66_spill] sm:$0xff] %v3649_v5  ;;  %4476 = vst [vmem:[#allocation67_spill] sm:$0xff] %v3651_v58  ;;  %v3665_v20 = vmul.f32 %v3643_v59, %v3643_v59  ;;  %v3669_v4 = vmul.f32 %v3649_v5, %v3649_v5  ;;  %v3673_v26 = vmul.f32 %v3651_v58, %v3651_v58 }
 0x2b6   :  { %4477 = vst [vmem:[#allocation68_spill] sm:$0xff] %v3653_v57  ;;  %4478 = vst [vmem:[#allocation69_spill] sm:$0xff] %v3655_v56  ;;  %v3677_v7 = vmul.f32 %v3653_v57, %v3653_v57  ;;  %v3681_v6 = vmul.f32 %v3655_v56, %v3655_v56  ;;  %v3685_v8 = vmul.f32 %v3657_v38, %v3657_v38 }
 0x2b7   :  { %4479 = vst [vmem:[#allocation70_spill] sm:$0xff] %v3657_v38  ;;  %4480 = vst [vmem:[#allocation71_spill] sm:$0xff] %v3659_v55  ;;  %v3689_v24 = vmul.f32 %v3659_v55, %v3659_v55  ;;  %v3693_v22 = vmul.f32 %v3661_v54, %v3661_v54  ;;  %v673_v48 = vrot.slane %v659_v23, %v4470_v30 }
 0x2b8   :  { %4481 = vst [vmem:[#allocation72_spill] sm:$0xff] %v3661_v54  ;;  %v674_v53 = vcombine.high %v3583_v18, %v3583_v18  ;;  %v682_v52 = vrot.slane %v3583_v18, %v4470_v30  ;;  %v610_v37 = vcombine.high %v3577_v49, %v3577_v49  ;;  %v617_v50 = vrot.slane %v3577_v49, %v4470_v30 }
 0x2b9   :  { %v3708_v54 = vrot.slane %v3585_v51, %v4470_v30  ;;  %v675_v38 = vcombine.high %v673_v48, %v673_v48  ;;  %v689_v57 = vrot.slane %v673_v48, %v4470_v30 }
 0x2ba   :  { %v696_v18 = vrot.slane %v674_v53, %v4470_v30  ;;  %v704_v56 = vcombine.high %v682_v52, %v682_v52  ;;  %v879_v5 = vmul.f32 0.0625, %v682_v52  ;;  %v624_v15 = vrot.slane %v610_v37, %v4470_v30 }
 0x2bb   :  { %4482 = vst [vmem:[#allocation73_spill] sm:$0xff] %v3708_v54  ;;  %v625_v49 = vcombine.high %v617_v50, %v617_v50  ;;  %v633_v35 = vrot.slane %v617_v50, %v4470_v30  ;;  %v703_v55 = vrot.slane %v675_v38, %v4470_v30  ;;  %v705_v31 = vcombine.high %v689_v57, %v689_v57 }
 0x2bc   :  { %v706_v21 = vcombine.high %v696_v18, %v696_v18  ;;  %v880_v58 = vmul.f32 0.0625, %v696_v18  ;;  %v881_v17 = vmul.f32 0.0625, %v704_v56  ;;  %v883_v59 = vmul.f32 0.0625, %v689_v57 }
 0x2bd   :  { %v943_v23 = vsub.f32 %v879_v5, %v3608_v25  ;;  %v626_v2 = vcombine.high %v624_v15, %v624_v15  ;;  %v707_v48 = vcombine.high %v703_v55, %v703_v55  ;;  %v884_v53 = vmul.f32 0.0625, %v703_v55 }
 0x2be   :  { %v882_v28 = vmul.f32 0.0625, %v706_v21  ;;  %v885_v54 = vmul.f32 0.0625, %v705_v31  ;;  %v944_v52 = vsub.f32 %v880_v58, %v3619_v29  ;;  %v945_v37 = vsub.f32 %v881_v17, %v3623_v34 }
 0x2bf   :  { %v947_v50 = vsub.f32 %v883_v59, %v3627_v36  ;;  %v975_v3 = vmax.f32 %v943_v23, 0.0  ;;  %v886_v38 = vmul.f32 0.0625, %v707_v48  ;;  %v948_v56 = vsub.f32 %v884_v53, %v3637_v9 }
 0x2c0   :  { %v946_v1 = vsub.f32 %v882_v28, %v3633_v16  ;;  %v949_v57 = vsub.f32 %v885_v54, %v3641_v40  ;;  %v976_v5 = vmax.f32 %v944_v52, 0.0  ;;  %v977_v25 = vmax.f32 %v945_v37, 0.0 }
 0x2c1   :  { %v979_v18 = vmax.f32 %v947_v50, 0.0  ;;  %v1007_v21 = vadd.f32 1e-05, %v975_v3  ;;  %v950_v31 = vsub.f32 %v886_v38, %v3647_v19  ;;  %v980_v58 = vmax.f32 %v948_v56, 0.0 }
 0x2c2   :  { %v978_v55 = vmax.f32 %v946_v1, 0.0  ;;  %v981_v29 = vmax.f32 %v949_v57, 0.0  ;;  %v1008_v17 = vadd.f32 1e-05, %v976_v5  ;;  %v1009_v34 = vadd.f32 1e-05, %v977_v25 }
 0x2c3   :  { %v1011_v59 = vadd.f32 1e-05, %v979_v18  ;;  %2949 = vrsqrt.f32 %v1007_v21  ;;  %v982_v36 = vmax.f32 %v950_v31, 0.0  ;;  %v1012_v28 = vadd.f32 1e-05, %v980_v58 }
 0x2c4   :  { %v1010_v23 = vadd.f32 1e-05, %v978_v55  ;;  %v640_v16 = vrot.slane %v624_v15, %v4470_v30  ;;  %v1013_v9 = vadd.f32 1e-05, %v981_v29  ;;  %2951 = vrsqrt.f32 %v1008_v17 }
 0x2c5   :  { %v647_v54 = vrot.slane %v625_v49, %v4470_v30  ;;  %v654_v3 = vrot.slane %v626_v2, %v4470_v30  ;;  %v1014_v40 = vadd.f32 1e-05, %v982_v36  ;;  %2953 = vrsqrt.f32 %v1009_v34 }
 0x2c6   :  { %v655_v1 = vcombine.high %v633_v35, %v633_v35  ;;  %v656_v19 = vcombine.high %v640_v16, %v640_v16  ;;  %2955 = vrsqrt.f32 %v1010_v23  ;;  %v871_v52 = vmul.f32 0.0625, %v633_v35 }
 0x2c7   :  { %v657_v48 = vcombine.high %v647_v54, %v647_v54  ;;  %v658_v53 = vcombine.high %v654_v3, %v654_v3  ;;  %2957 = vrsqrt.f32 %v1011_v59  ;;  %v872_v37 = vmul.f32 0.0625, %v647_v54 }
 0x2c8   :  { %v873_v50 = vmul.f32 0.0625, %v655_v1  ;;  %v875_v38 = vmul.f32 0.0625, %v640_v16  ;;  %2959 = vrsqrt.f32 %v1012_v28  ;;  %v876_v56 = vmul.f32 0.0625, %v654_v3 }
 0x2c9   :  { %v874_v15 = vmul.f32 0.0625, %v657_v48  ;;  %v877_v57 = vmul.f32 0.0625, %v656_v19  ;;  %2961 = vrsqrt.f32 %v1013_v9  ;;  %v878_v49 = vmul.f32 0.0625, %v658_v53 }
 0x2ca   :  { %v935_v2 = vsub.f32 %v871_v52, %v3665_v20  ;;  %v936_v5 = vsub.f32 %v872_v37, %v3669_v4  ;;  %2963 = vrsqrt.f32 %v1014_v40  ;;  %v937_v25 = vsub.f32 %v873_v50, %v3673_v26 }
 0x2cb   :  { %v938_v18 = vsub.f32 %v874_v15, %v3681_v6  ;;  %v939_v35 = vsub.f32 %v875_v38, %v3677_v7  ;;  %v940_v21 = vsub.f32 %v876_v56, %v3685_v8  ;;  %v941_v31 = vsub.f32 %v877_v57, %v3689_v24 }
 0x2cc   :  { %v942_v55 = vsub.f32 %v878_v49, %v3693_v22  ;;  %v967_v58 = vmax.f32 %v935_v2, 0.0  ;;  %v968_v17 = vmax.f32 %v936_v5, 0.0  ;;  %v969_v34 = vmax.f32 %v937_v25, 0.0 }
 0x2cd   :  { %v2950_v29 = vpop.eup %2949  ;;  %v970_v20 = vmax.f32 %v938_v18, 0.0  ;;  %v971_v59 = vmax.f32 %v939_v35, 0.0  ;;  %v972_v6 = vmax.f32 %v940_v21, 0.0  ;;  %v973_v36 = vmax.f32 %v941_v31, 0.0 }
 0x2ce   :  { %v3737_v4 = vmul.f32 %v2950_v29, %v3403_v41  ;;  %v1767_v26 = vmul.f32 %v2950_v29, %v3591_v27  ;;  %v2952_v7 = vpop.eup %2951  ;;  %v974_v23 = vmax.f32 %v942_v55, 0.0  ;;  %v999_v8 = vadd.f32 1e-05, %v967_v58 }
 0x2cf   :  { %v1000_v28 = vadd.f32 1e-05, %v968_v17  ;;  %v4483_v24 = vcombine.high %v3585_v51, %v3585_v51  ;;  %v2954_v16 = vpop.eup %2953  ;;  %v3745_v9 = vmul.f32 %v2952_v7, %v3407_v42  ;;  %v1768_v54 = vmul.f32 %v2952_v7, %v3598_v14  ;;  %v4500_v7 = vld [vmem:[#allocation73_spill] sm:$0xff] }
 0x2d0   :  { %v1799_v3 = vmul.f32 %v1767_v26, %v3403_v41  ;;  %v1001_v27 = vadd.f32 1e-05, %v969_v34  ;;  %v2956_v40 = vpop.eup %2955  ;;  %v3750_v1 = vmul.f32 %v2954_v16, %v3411_v43  ;;  %v1769_v19 = vmul.f32 %v2954_v16, %v3602_v60 }
 0x2d1   :  { %v442_v22 = vrot.slane %v4483_v24, %v4470_v30  ;;  %v1002_v48 = vadd.f32 1e-05, %v970_v20  ;;  %v1003_v53 = vadd.f32 1e-05, %v971_v59  ;;  %v2958_v52 = vpop.eup %2957  ;;  %v3754_v51 = vmul.f32 %v2956_v40, %v3415_v44 }
 0x2d2   :  { %v1770_v37 = vmul.f32 %v2956_v40, %v3611_v12  ;;  %v1800_v50 = vmul.f32 %v1768_v54, %v3407_v42  ;;  %v4484_v41 = vrot.slane %v3291_v61, %v3363_v33  ;;  %v2960_v38 = vpop.eup %2959  ;;  %v3764_v15 = vmul.f32 %v2958_v52, %v3419_v39 }
 0x2d3   :  { %v1771_v60 = vmul.f32 %v2958_v52, %v3604_v13  ;;  %v1801_v56 = vmul.f32 %v1769_v19, %v3411_v43  ;;  %v2962_v49 = vpop.eup %2961  ;;  %v3771_v12 = vmul.f32 %v2960_v38, %v3423_v45  ;;  %v1772_v42 = vmul.f32 %v2960_v38, %v3613_v32 }
 0x2d4   :  { %v3761_v14 = vsub.f32 %v4484_v41, %v1799_v3  ;;  %v1802_v61 = vmul.f32 %v1770_v37, %v3415_v44  ;;  %v4486_v2 = vrot.slane %v3293_v62, %v3363_v33  ;;  %v2964_v25 = vpop.eup %2963  ;;  %v3781_v13 = vmul.f32 %v2962_v49, %v3427_v46 }
 0x2d5   :  { %v1773_v43 = vmul.f32 %v2962_v49, %v3615_v11  ;;  %v1803_v18 = vmul.f32 %v1771_v60, %v3419_v39  ;;  %v4488_v35 = vrot.slane %v3295_v63, %v3363_v33  ;;  %v3791_v44 = vmul.f32 %v2964_v25, %v3431_v47  ;;  %v4493_v11 = vld [vmem:[#allocation18_spill] sm:$0xff] }
 0x2d6   :  { %4485 = vst [vmem:[#allocation74_spill] sm:$0xff] %v3761_v14  ;;  %v3778_v5 = vsub.f32 %v4486_v2, %v1800_v50  ;;  %v1774_v62 = vmul.f32 %v2964_v25, %v3629_v10  ;;  %v3795_v32 = vmul.f32 %v1772_v42, %v3423_v45  ;;  %v4491_v31 = vrot.slane %v3297_v0, %v3363_v33 }
 0x2d7   :  { %v3788_v21 = vsub.f32 %v4488_v35, %v1801_v56  ;;  %v1805_v39 = vmul.f32 %v1773_v43, %v3427_v46  ;;  %v4494_v63 = vrot.slane %v4493_v11, %v3363_v33  ;;  %v1004_v17 = vadd.f32 1e-05, %v972_v6  ;;  %v4497_v46 = vld [vmem:[#allocation20_spill] sm:$0xff] }
 0x2d8   :  { %4487 = vst [vmem:[#allocation75_spill] sm:$0xff] %v3778_v5  ;;  %4490 = vst [vmem:[#allocation77_spill] sm:$0xff] %v3795_v32  ;;  %v3800_v55 = vsub.f32 %v4491_v31, %v1802_v61  ;;  %v3813_v45 = vmul.f32 %v1774_v62, %v3431_v47  ;;  %v1005_v34 = vadd.f32 1e-05, %v973_v36  ;;  %v4498_v20 = vrot.slane %v4497_v46, %v3363_v33  ;;  %v4501_v36 = vld [vmem:[#allocation5_spill] sm:$0xff] }
 0x2d9   :  { %4489 = vst [vmem:[#allocation76_spill] sm:$0xff] %v3788_v21  ;;  %v3806_v58 = vsub.f32 %v4494_v63, %v1803_v18  ;;  %v1006_v26 = vadd.f32 1e-05, %v974_v23  ;;  %2965 = vrsqrt.f32 %v999_v8  ;;  %v443_v24 = vcombine.high %v4500_v7, %v4500_v7  ;;  %v4509_v63 = vld [vmem:[#allocation63_spill] sm:$0xff] }
 0x2da   :  { %4492 = vst [vmem:[#allocation78_spill] sm:$0xff] %v3800_v55  ;;  %4496 = vst [vmem:[#allocation79_spill] sm:$0xff] %v3813_v45  ;;  %v3820_v59 = vsub.f32 %v4498_v20, %v1805_v39  ;;  %2967 = vrsqrt.f32 %v1000_v28  ;;  %v444_v16 = vcombine.high %v442_v22, %v442_v22  ;;  %v451_v47 = vrot.slane %v4500_v7, %v4470_v30  ;;  %v4510_v20 = vld [vmem:[#allocation65_spill] sm:$0xff] }
 0x2db   :  { %4495 = vst [vmem:[#allocation18_spill] sm:$0xff] %v3806_v58  ;;  %v458_v54 = vrot.slane %v442_v22, %v4470_v30  ;;  %2969 = vrsqrt.f32 %v1001_v27  ;;  %v465_v6 = vrot.slane %v443_v24, %v4470_v30  ;;  %v386_v3 = vrot.slane %v4501_v36, %v4470_v30 }
 0x2dc   :  { %4499 = vst [vmem:[#allocation20_spill] sm:$0xff] %v3820_v59  ;;  %v4502_v23 = vcombine.high %v4501_v36, %v4501_v36  ;;  %2971 = vrsqrt.f32 %v1002_v48  ;;  %v472_v28 = vrot.slane %v444_v16, %v4470_v30  ;;  %v473_v40 = vcombine.high %v451_v47, %v451_v47  ;;  %v4511_v16 = vld [vmem:[#allocation64_spill] sm:$0xff] }
 0x2dd   :  { %v474_v19 = vcombine.high %v458_v54, %v458_v54  ;;  %2973 = vrsqrt.f32 %v1003_v53  ;;  %v475_v52 = vcombine.high %v465_v6, %v465_v6  ;;  %v3835_v37 = vmul.f32 0.0625, %v451_v47 }
 0x2de   :  { %v393_v8 = vrot.slane %v4502_v23, %v4470_v30  ;;  %v3837_v22 = vmul.f32 0.0625, %v465_v6  ;;  %2975 = vrsqrt.f32 %v1004_v17  ;;  %v476_v27 = vcombine.high %v472_v28, %v472_v28 }
 0x2df   :  { %v3839_v50 = vmul.f32 0.0625, %v473_v40  ;;  %v3841_v41 = vmul.f32 0.0625, %v458_v54  ;;  %2977 = vrsqrt.f32 %v1005_v34  ;;  %v3843_v38 = vmul.f32 0.0625, %v475_v52 }
 0x2e0   :  { %4503 = vst [vmem:[#allocation73_spill] sm:$0xff] %v3837_v22  ;;  %v3845_v48 = vmul.f32 0.0625, %v472_v28  ;;  %v3847_v60 = vmul.f32 0.0625, %v474_v19  ;;  %2979 = vrsqrt.f32 %v1006_v26  ;;  %v3849_v53 = vmul.f32 0.0625, %v476_v27  ;;  %v4513_v28 = vld [vmem:[#allocation67_spill] sm:$0xff] }
 0x2e1   :  { %4504 = vst [vmem:[#allocation5_spill] sm:$0xff] %v3841_v41  ;;  %4505 = vst [vmem:[#allocation80_spill] sm:$0xff] %v3843_v38  ;;  %v3853_v56 = vmul.f32 %v3835_v37, %v3835_v37  ;;  %v3857_v49 = vmul.f32 %v3837_v22, %v3837_v22  ;;  %v3861_v42 = vmul.f32 %v3839_v50, %v3839_v50 }
 0x2e2   :  { %4506 = vst [vmem:[#allocation81_spill] sm:$0xff] %v3845_v48  ;;  %4507 = vst [vmem:[#allocation82_spill] sm:$0xff] %v3847_v60  ;;  %v3865_v61 = vmul.f32 %v3843_v38, %v3843_v38  ;;  %v3869_v2 = vmul.f32 %v3841_v41, %v3841_v41  ;;  %v3873_v25 = vmul.f32 %v3845_v48, %v3845_v48 }
 0x2e3   :  { %4508 = vst [vmem:[#allocation83_spill] sm:$0xff] %v3849_v53  ;;  %v3877_v43 = vmul.f32 %v3847_v60, %v3847_v60  ;;  %v3881_v18 = vmul.f32 %v3849_v53, %v3849_v53  ;;  %v394_v35 = vcombine.high %v386_v3, %v386_v3  ;;  %v395_v62 = vcombine.high %v393_v8, %v393_v8  ;;  %v2966_v31 = vpop.eup %2965 }
 0x2e4   :  { %v402_v39 = vrot.slane %v386_v3, %v4470_v30  ;;  %v409_v11 = vrot.slane %v393_v8, %v4470_v30  ;;  %v757_v17 = vcombine.high %v4509_v63, %v4509_v63  ;;  %v764_v34 = vrot.slane %v4509_v63, %v4470_v30  ;;  %v3889_v46 = vpop.eup %2967 }
 0x2e5   :  { %v3892_v26 = vmul.f32 %v2966_v31, %v4510_v20  ;;  %v416_v7 = vrot.slane %v394_v35, %v4470_v30  ;;  %v423_v24 = vrot.slane %v395_v62, %v4470_v30  ;;  %v708_v47 = vcombine.high %v4511_v16, %v4511_v16  ;;  %v3898_v54 = vpop.eup %2969 }
 0x2e6   :  { %v424_v6 = vcombine.high %v402_v39, %v402_v39  ;;  %v425_v36 = vcombine.high %v409_v11, %v409_v11  ;;  %v3900_v3 = vmul.f32 0.0625, %v402_v39  ;;  %v3902_v23 = vmul.f32 0.0625, %v409_v11  ;;  %v3904_v8 = vpop.eup %2971 }
 0x2e7   :  { %v3908_v40 = vmul.f32 %v3898_v54, %v4513_v28  ;;  %v426_v19 = vcombine.high %v416_v7, %v416_v7  ;;  %v427_v52 = vcombine.high %v423_v24, %v423_v24  ;;  %v3910_v27 = vmul.f32 0.0625, %v416_v7  ;;  %v3912_v35 = vpop.eup %2973 }
 0x2e8   :  { %4512 = vst [vmem:[#allocation63_spill] sm:$0xff] %v3902_v23  ;;  %v3914_v62 = vmul.f32 0.0625, %v424_v6  ;;  %v3916_v63 = vmul.f32 0.0625, %v423_v24  ;;  %v3918_v39 = vmul.f32 0.0625, %v425_v36  ;;  %v3922_v11 = vmul.f32 %v3900_v3, %v3900_v3  ;;  %v3924_v20 = vpop.eup %2975 }
 0x2e9   :  { %4514 = vst [vmem:[#allocation65_spill] sm:$0xff] %v3910_v27  ;;  %v3926_v28 = vmul.f32 0.0625, %v426_v19  ;;  %v3928_v0 = vmul.f32 0.0625, %v427_v52  ;;  %v3932_v7 = vmul.f32 %v3910_v27, %v3910_v27  ;;  %v3936_v24 = vmul.f32 %v3902_v23, %v3902_v23  ;;  %v3938_v6 = vpop.eup %2977 }
 0x2ea   :  { %4515 = vst [vmem:[#allocation64_spill] sm:$0xff] %v3916_v63  ;;  %4516 = vst [vmem:[#allocation67_spill] sm:$0xff] %v3918_v39  ;;  %v3942_v36 = vmul.f32 %v3914_v62, %v3914_v62  ;;  %v3946_v19 = vmul.f32 %v3916_v63, %v3916_v63  ;;  %v3950_v52 = vmul.f32 %v3918_v39, %v3918_v39  ;;  %v3953_v29 = vpop.eup %2979 }
 0x2eb   :  { %4517 = vst [vmem:[#allocation84_spill] sm:$0xff] %v3926_v28  ;;  %4518 = vst [vmem:[#allocation85_spill] sm:$0xff] %v3928_v0  ;;  %v771_v10 = vrot.slane %v757_v17, %v4470_v30  ;;  %v3957_v57 = vmul.f32 %v3926_v28, %v3926_v28  ;;  %v3961_v53 = vmul.f32 %v3928_v0, %v3928_v0  ;;  %v4519_v28 = vld [vmem:[#allocation34_spill] sm:$0xff] }
 0x2ec   :  { %v772_v60 = vcombine.high %v764_v34, %v764_v34  ;;  %v780_v48 = vrot.slane %v764_v34, %v4470_v30  ;;  %v715_v22 = vrot.slane %v4511_v16, %v4470_v30  ;;  %v722_v17 = vrot.slane %v708_v47, %v4470_v30 }
 0x2ed   :  { %v773_v41 = vcombine.high %v771_v10, %v771_v10  ;;  %v787_v38 = vrot.slane %v771_v10, %v4470_v30  ;;  %v3970_v27 = vmul.f32 %v2966_v31, %v4519_v28 }
 0x2ee   :  { %v794_v39 = vrot.slane %v772_v60, %v4470_v30  ;;  %v802_v63 = vcombine.high %v780_v48, %v780_v48  ;;  %v895_v23 = vmul.f32 0.0625, %v780_v48  ;;  %v723_v34 = vcombine.high %v715_v22, %v715_v22 }
 0x2ef   :  { %v801_v0 = vrot.slane %v773_v41, %v4470_v30  ;;  %v803_v59 = vcombine.high %v787_v38, %v787_v38  ;;  %v899_v58 = vmul.f32 0.0625, %v787_v38 }
 0x2f0   :  { %v804_v21 = vcombine.high %v794_v39, %v794_v39  ;;  %v896_v55 = vmul.f32 0.0625, %v794_v39  ;;  %v897_v10 = vmul.f32 0.0625, %v802_v63  ;;  %v959_v14 = vsub.f32 %v895_v23, %v3853_v56 }
 0x2f1   :  { %v805_v16 = vcombine.high %v801_v0, %v801_v0  ;;  %v900_v5 = vmul.f32 0.0625, %v801_v0  ;;  %v901_v47 = vmul.f32 0.0625, %v803_v59  ;;  %v963_v60 = vsub.f32 %v899_v58, %v3869_v2 }
 0x2f2   :  { %v898_v45 = vmul.f32 0.0625, %v804_v21  ;;  %v960_v48 = vsub.f32 %v896_v55, %v3857_v49  ;;  %v961_v31 = vsub.f32 %v897_v10, %v3861_v42  ;;  %v991_v32 = vmax.f32 %v959_v14, 0.0 }
 0x2f3   :  { %v902_v41 = vmul.f32 0.0625, %v805_v16  ;;  %v964_v38 = vsub.f32 %v900_v5, %v3873_v25  ;;  %v965_v33 = vsub.f32 %v901_v47, %v3877_v43  ;;  %v995_v39 = vmax.f32 %v963_v60, 0.0 }
 0x2f4   :  { %v962_v63 = vsub.f32 %v898_v45, %v3865_v61  ;;  %v992_v56 = vmax.f32 %v960_v48, 0.0  ;;  %v993_v23 = vmax.f32 %v961_v31, 0.0  ;;  %v1023_v0 = vadd.f32 1e-05, %v991_v32 }
 0x2f5   :  { %v966_v59 = vsub.f32 %v902_v41, %v3881_v18  ;;  %v996_v58 = vmax.f32 %v964_v38, 0.0  ;;  %v997_v21 = vmax.f32 %v965_v33, 0.0  ;;  %v1027_v2 = vadd.f32 1e-05, %v995_v39 }
 0x2f6   :  { %v994_v55 = vmax.f32 %v962_v63, 0.0  ;;  %v1024_v49 = vadd.f32 1e-05, %v992_v56  ;;  %v1025_v42 = vadd.f32 1e-05, %v993_v23  ;;  %2981 = vrsqrt.f32 %v1023_v0 }
 0x2f7   :  { %v998_v14 = vmax.f32 %v966_v59, 0.0  ;;  %v1028_v10 = vadd.f32 1e-05, %v996_v58  ;;  %v1029_v5 = vadd.f32 1e-05, %v997_v21  ;;  %2983 = vrsqrt.f32 %v1027_v2 }
 0x2f8   :  { %v1026_v25 = vadd.f32 1e-05, %v994_v55  ;;  %2985 = vrsqrt.f32 %v1024_v49  ;;  %v724_v43 = vcombine.high %v722_v17, %v722_v17  ;;  %v731_v45 = vrot.slane %v715_v22, %v4470_v30 }
 0x2f9   :  { %v1030_v61 = vadd.f32 1e-05, %v998_v14  ;;  %2987 = vrsqrt.f32 %v1025_v42  ;;  %v738_v32 = vrot.slane %v722_v17, %v4470_v30  ;;  %v745_v33 = vrot.slane %v723_v34, %v4470_v30 }
 0x2fa   :  { %2989 = vrsqrt.f32 %v1026_v25  ;;  %v752_v18 = vrot.slane %v724_v43, %v4470_v30  ;;  %v753_v16 = vcombine.high %v731_v45, %v731_v45  ;;  %v887_v47 = vmul.f32 0.0625, %v731_v45 }
 0x2fb   :  { %2991 = vrsqrt.f32 %v1028_v10  ;;  %v754_v60 = vcombine.high %v738_v32, %v738_v32  ;;  %v755_v48 = vcombine.high %v745_v33, %v745_v33  ;;  %v888_v31 = vmul.f32 0.0625, %v745_v33  ;;  %v4520_v33 = vld [vmem:[#allocation33_spill] sm:$0xff] }
 0x2fc   :  { %2993 = vrsqrt.f32 %v1029_v5  ;;  %v756_v41 = vcombine.high %v752_v18, %v752_v18  ;;  %v889_v38 = vmul.f32 0.0625, %v753_v16  ;;  %v891_v39 = vmul.f32 0.0625, %v738_v32 }
 0x2fd   :  { %2995 = vrsqrt.f32 %v1030_v61  ;;  %v890_v22 = vmul.f32 0.0625, %v755_v48  ;;  %v892_v63 = vmul.f32 0.0625, %v752_v18  ;;  %v893_v56 = vmul.f32 0.0625, %v754_v60 }
 0x2fe   :  { %v894_v17 = vmul.f32 0.0625, %v756_v41  ;;  %v951_v34 = vsub.f32 %v887_v47, %v3922_v11  ;;  %v952_v23 = vsub.f32 %v888_v31, %v3932_v7  ;;  %v953_v0 = vsub.f32 %v889_v38, %v3942_v36  ;;  %v4521_v41 = vld [vmem:[#allocation35_spill] sm:$0xff] }
 0x2ff   :  { %v954_v59 = vsub.f32 %v890_v22, %v3957_v57  ;;  %v955_v58 = vsub.f32 %v891_v39, %v3936_v24  ;;  %v956_v21 = vsub.f32 %v892_v63, %v3946_v19  ;;  %v957_v2 = vsub.f32 %v893_v56, %v3950_v52  ;;  %v4522_v39 = vld [vmem:[#allocation36_spill] sm:$0xff]  ;;  %v4523_v63 = vld [vmem:[#allocation37_spill] sm:$0xff] }
 0x300   :  { %v3992_v55 = vpop.eup %2981  ;;  %v958_v49 = vsub.f32 %v894_v17, %v3961_v53  ;;  %v983_v42 = vmax.f32 %v951_v34, 0.0  ;;  %v984_v14 = vmax.f32 %v952_v23, 0.0  ;;  %v985_v10 = vmax.f32 %v953_v0, 0.0  ;;  %v4525_v23 = vld [vmem:[#allocation39_spill] sm:$0xff] }
 0x301   :  { %v3995_v11 = vpop.eup %2983  ;;  %v3999_v7 = vmul.f32 %v3992_v55, %v3835_v37  ;;  %v986_v57 = vmax.f32 %v954_v59, 0.0  ;;  %v987_v36 = vmax.f32 %v955_v58, 0.0  ;;  %v988_v24 = vmax.f32 %v956_v21, 0.0  ;;  %v4526_v59 = vld [vmem:[#allocation40_spill] sm:$0xff] }
 0x302   :  { %v4001_v5 = vpop.eup %2985  ;;  %v989_v19 = vmax.f32 %v957_v2, 0.0  ;;  %v990_v52 = vmax.f32 %v958_v49, 0.0  ;;  %v1015_v25 = vadd.f32 1e-05, %v983_v42  ;;  %v1016_v43 = vadd.f32 1e-05, %v984_v14 }
 0x303   :  { %v4003_v45 = vpop.eup %2987  ;;  %v1017_v53 = vadd.f32 1e-05, %v985_v10  ;;  %v1018_v61 = vadd.f32 1e-05, %v986_v57  ;;  %v1019_v32 = vadd.f32 1e-05, %v987_v36  ;;  %v1728_v18 = vmul.f32 %v3889_v46, %v4520_v33 }
 0x304   :  { %v4007_v16 = vpop.eup %2989  ;;  %v4011_v37 = vmul.f32 %v4003_v45, %v3839_v50  ;;  %v1020_v47 = vadd.f32 1e-05, %v988_v24  ;;  %v1021_v60 = vadd.f32 1e-05, %v989_v19  ;;  %v1022_v48 = vadd.f32 1e-05, %v990_v52 }
 0x305   :  { %v4013_v31 = vpop.eup %2991  ;;  %2997 = vrsqrt.f32 %v1015_v25  ;;  %v1729_v38 = vmul.f32 %v3898_v54, %v4521_v41  ;;  %v1730_v22 = vmul.f32 %v3904_v8, %v4522_v39  ;;  %v1731_v56 = vmul.f32 %v3912_v35, %v4523_v63  ;;  %v4524_v50 = vld [vmem:[#allocation38_spill] sm:$0xff] }
 0x306   :  { %v4021_v17 = vpop.eup %2993  ;;  %2999 = vrsqrt.f32 %v1016_v43  ;;  %v1732_v34 = vmul.f32 %v3924_v20, %v4524_v50  ;;  %v1733_v0 = vmul.f32 %v3938_v6, %v4525_v23  ;;  %v1734_v58 = vmul.f32 %v3953_v29, %v4526_v59 }
 0x307   :  { %v4029_v21 = vpop.eup %2995  ;;  %3001 = vrsqrt.f32 %v1017_v53  ;;  %v2144_v54 = vcombine.low %v3970_v27, %v1728_v18  ;;  %v2145_v2 = vcombine.low %v1729_v38, %v1730_v22  ;;  %v4527_v49 = vcombine.low %v3737_v4, %v3745_v9  ;;  %v4531_v53 = vld [vmem:[#allocation66_spill] sm:$0xff]  ;;  %v4533_v22 = vld [vmem:[#allocation68_spill] sm:$0xff] }
 0x308   :  { %3003 = vrsqrt.f32 %v1018_v61  ;;  %v2146_v14 = vcombine.low %v1731_v56, %v1732_v34  ;;  %v2147_v10 = vcombine.low %v1733_v0, %v1734_v58  ;;  %v4528_v57 = vcombine.low %v3750_v1, %v3754_v51  ;;  %v4536_v0 = vld [vmem:[#allocation72_spill] sm:$0xff] }
 0x309   :  { %v2203_v42 = vrot.slane %v4527_v49, %v4470_v30  ;;  %3005 = vrsqrt.f32 %v1019_v32  ;;  %v2154_v24 = vrot.slane %v2144_v54, %v4470_v30  ;;  %v2161_v27 = vrot.slane %v2145_v2, %v4470_v30 }
 0x30a   :  { %v2210_v36 = vrot.slane %v4528_v57, %v4470_v30  ;;  %v4529_v19 = vcombine.low %v3764_v15, %v3771_v12  ;;  %3007 = vrsqrt.f32 %v1020_v47  ;;  %v2168_v4 = vrot.slane %v2146_v14, %v4470_v30  ;;  %v4532_v12 = vld [vmem:[#allocation69_spill] sm:$0xff] }
 0x30b   :  { %v2175_v9 = vrot.slane %v2147_v10, %v4470_v30  ;;  %v4530_v1 = vcombine.low %v3781_v13, %v3791_v44  ;;  %3009 = vrsqrt.f32 %v1021_v60  ;;  %v2176_v25 = vcombine.low %v2154_v24, %v2161_v27  ;;  %v4534_v44 = vld [vmem:[#allocation70_spill] sm:$0xff]  ;;  %v4537_v10 = vld [vmem:[#allocation45_spill] sm:$0xff] }
 0x30c   :  { %v2217_v52 = vrot.slane %v4529_v19, %v4470_v30  ;;  %v2225_v43 = vcombine.low %v2203_v42, %v2210_v36  ;;  %v1760_v61 = vmul.f32 %v3889_v46, %v4531_v53  ;;  %3011 = vrsqrt.f32 %v1022_v48  ;;  %v4535_v48 = vld [vmem:[#allocation71_spill] sm:$0xff]  ;;  %v4538_v36 = vld [vmem:[#allocation46_spill] sm:$0xff] }
 0x30d   :  { %v2224_v51 = vrot.slane %v4530_v1, %v4470_v30  ;;  %v2177_v32 = vcombine.low %v2168_v4, %v2175_v9  ;;  %v1762_v18 = vmul.f32 %v3904_v8, %v4532_v12  ;;  %v2184_v47 = vrot.slane %v2176_v25, %v4470_v30  ;;  %v4540_v19 = vld [vmem:[#allocation10_spill] sm:$0xff]  ;;  %v4549_v12 = vld [vmem:[#allocation13_spill] sm:$0xff] }
 0x30e   :  { %v2233_v38 = vrot.slane %v2225_v43, %v4470_v30  ;;  %v1763_v13 = vmul.f32 %v3912_v35, %v4533_v22  ;;  %v1764_v60 = vmul.f32 %v3924_v20, %v4534_v44  ;;  %v1765_v34 = vmul.f32 %v3938_v6, %v4535_v48  ;;  %v4546_v43 = vld [vmem:[#allocation12_spill] sm:$0xff]  ;;  %v4553_v44 = vld [vmem:[#allocation15_spill] sm:$0xff]  ;;  %v4555_v48 = vld [vmem:[#allocation50_spill] sm:$0xff] }
 0x30f   :  { %v2226_v15 = vcombine.low %v2217_v52, %v2224_v51  ;;  %v2191_v56 = vrot.slane %v2177_v32, %v4470_v30  ;;  %v1766_v8 = vmul.f32 %v3953_v29, %v4536_v0  ;;  %v2998_v58 = vpop.eup %2997  ;;  %v1791_v54 = vmul.f32 %v3892_v26, %v4519_v28  ;;  %v4541_v52 = vld [vmem:[#allocation32_spill] sm:$0xff]  ;;  %v4548_v32 = vld [vmem:[#allocation49_spill] sm:$0xff] }
 0x310   :  { %v1792_v2 = vmul.f32 %v1760_v61, %v4520_v33  ;;  %v1793_v35 = vmul.f32 %v3908_v40, %v4521_v41  ;;  %v1794_v20 = vmul.f32 %v1762_v18, %v4522_v39  ;;  %v4074_v49 = vpop.eup %2999  ;;  %v4077_v42 = vmul.f32 %v2998_v58, %v3900_v3  ;;  %v4539_v3 = vld [vmem:[#allocation47_spill] sm:$0xff] }
 0x311   :  { %v2240_v46 = vrot.slane %v2226_v15, %v4470_v30  ;;  %v2192_v6 = vcombine.low %v2184_v47, %v2191_v56  ;;  %v1743_v29 = vmul.f32 %v2998_v58, %v4537_v10  ;;  %v3002_v57 = vpop.eup %3001  ;;  %v1744_v26 = vmul.f32 %v4074_v49, %v4538_v36  ;;  %v4556_v58 = vld [vmem:[#allocation16_spill] sm:$0xff] }
 0x312   :  { %v1795_v28 = vmul.f32 %v1763_v13, %v4523_v63  ;;  %v1796_v33 = vmul.f32 %v1764_v60, %v4524_v50  ;;  %v1797_v40 = vmul.f32 %v1765_v34, %v4525_v23  ;;  %v4085_v41 = vpop.eup %3003  ;;  %v4088_v39 = vmul.f32 %v3002_v57, %v3914_v62  ;;  %v4543_v50 = vld [vmem:[#allocation48_spill] sm:$0xff]  ;;  %v4544_v62 = vld [vmem:[#allocation11_spill] sm:$0xff] }
 0x313   :  { %v2241_v14 = vcombine.low %v2233_v38, %v2240_v46  ;;  %2886 = vmatprep.mubr.msk.f32.mxu1 %vm2340_vm9, %v2192_v6  ;;  %v1745_v24 = vmul.f32 %v3002_v57, %v4539_v3  ;;  %v1798_v27 = vmul.f32 %v1766_v8, %v4526_v59  ;;  %v4542_v4 = vrot.slane %v4540_v19, %v4541_v52  ;;  %v4096_v63 = vpop.eup %3005  ;;  %v4551_v38 = vld [vmem:[#allocation14_spill] sm:$0xff] }
 0x314   :  { %v1746_v23 = vmul.f32 %v4085_v41, %v4543_v50  ;;  %v2242_v1 = vcombine.low %v1743_v29, %v1744_v26  ;;  %v4545_v51 = vrot.slane %v4544_v62, %v4541_v52  ;;  %v4547_v53 = vrot.slane %v4546_v43, %v4541_v52  ;;  %v4107_v61 = vpop.eup %3007 }
 0x315   :  { %v2079_v9 = vsub.f32 %v4542_v4, %v1791_v54  ;;  %2887 = vmatmul.mubr.msk.f32.vlgmr.msra.gmra.mrb[4].mxu1 %vm2340_vm9, %v2241_v14  ;;  %v1747_v15 = vmul.f32 %v4096_v63, %v4548_v32  ;;  %v4550_v18 = vrot.slane %v4549_v12, %v4541_v52  ;;  %v4552_v22 = vrot.slane %v4551_v38, %v4541_v52  ;;  %v4120_v46 = vpop.eup %3009  ;;  %v4559_v14 = vld [vmem:[#allocation17_spill] sm:$0xff]  ;;  %v4563_v12 = vld [vmem:[#allocation54_spill] sm:$0xff] }
 0x316   :  { %v2080_v25 = vsub.f32 %v4545_v51, %v1792_v2  ;;  %v2081_v59 = vsub.f32 %v4547_v53, %v1793_v35  ;;  %v4554_v60 = vrot.slane %v4553_v44, %v4541_v52  ;;  %v1748_v34 = vmul.f32 %v4107_v61, %v4555_v48  ;;  %v4128_v35 = vpop.eup %3011  ;;  %v4562_v51 = vld [vmem:[#allocation53_spill] sm:$0xff] }
 0x317   :  { %v2082_v47 = vsub.f32 %v4550_v18, %v1794_v20  ;;  %v2083_v13 = vsub.f32 %v4552_v22, %v1795_v28  ;;  %v2243_v0 = vcombine.low %v1745_v24, %v1746_v23  ;;  %v2252_v8 = vrot.slane %v2242_v1, %v4470_v30  ;;  %v4558_v20 = vld [vmem:[#allocation51_spill] sm:$0xff] }
 0x318   :  { %v2084_v56 = vsub.f32 %v4554_v60, %v1796_v33  ;;  %v4557_v54 = vrot.slane %v4556_v58, %v4541_v52  ;;  %v1749_v6 = vmul.f32 %v4120_v46, %v4558_v20  ;;  %v4560_v29 = vrot.slane %v4559_v14, %v4541_v52  ;;  %v4561_v33 = vld [vmem:[#allocation52_spill] sm:$0xff]  ;;  %v4566_v60 = vld [vmem:[#allocation57_spill] sm:$0xff] }
 0x319   :  { %v2470_v26 = vcombine.low %v2079_v9, %v2080_v25  ;;  %v2471_v28 = vcombine.low %v2081_v59, %v2082_v47  ;;  %v1750_v24 = vmul.f32 %v4128_v35, %v4561_v33  ;;  %v2244_v19 = vcombine.low %v1747_v15, %v1748_v34  ;;  %v4564_v47 = vld [vmem:[#allocation55_spill] sm:$0xff] }
 0x31a   :  { %v2085_v2 = vsub.f32 %v4557_v54, %v1797_v40  ;;  %v2086_v57 = vsub.f32 %v4560_v29, %v1798_v27  ;;  %v2259_v4 = vrot.slane %v2243_v0, %v4470_v30  ;;  %v2472_v23 = vcombine.low %v2083_v13, %v2084_v56  ;;  %v4568_v54 = vld [vmem:[#allocation59_spill] sm:$0xff] }
 0x31b   :  { %v2480_v40 = vrot.slane %v2470_v26, %v4470_v30  ;;  %v2487_v62 = vrot.slane %v2471_v28, %v4470_v30  ;;  %v1751_v43 = vmul.f32 %v3992_v55, %v4562_v51  ;;  %v2245_v53 = vcombine.low %v1749_v6, %v1750_v24  ;;  %v4565_v55 = vld [vmem:[#allocation56_spill] sm:$0xff]  ;;  %v4570_v24 = vld [vmem:[#allocation77_spill] sm:$0xff] }
 0x31c   :  { %v2473_v1 = vcombine.low %v2085_v2, %v2086_v57  ;;  %v2266_v27 = vrot.slane %v2244_v19, %v4470_v30  ;;  %v2274_v9 = vcombine.low %v2252_v8, %v2259_v4  ;;  %v2494_v25 = vrot.slane %v2472_v23, %v4470_v30  ;;  %v4567_v8 = vld [vmem:[#allocation58_spill] sm:$0xff]  ;;  %v4569_v6 = vld [vmem:[#allocation60_spill] sm:$0xff]  ;;  %v4571_v19 = vld [vmem:[#allocation19_spill] sm:$0xff] }
 0x31d   :  { %v2502_v15 = vcombine.low %v2480_v40, %v2487_v62  ;;  %v1752_v18 = vmul.f32 %v4001_v5, %v4563_v12  ;;  %v1753_v38 = vmul.f32 %v4003_v45, %v4564_v47  ;;  %v2273_v22 = vrot.slane %v2245_v53, %v4470_v30  ;;  %v4574_v40 = vld [vmem:[#allocation21_spill] sm:$0xff] }
 0x31e   :  { %v2501_v59 = vrot.slane %v2473_v1, %v4470_v30  ;;  %v2282_v13 = vrot.slane %v2274_v9, %v4470_v30  ;;  %v1754_v44 = vmul.f32 %v4007_v16, %v4565_v55  ;;  %v1755_v56 = vmul.f32 %v3995_v11, %v4566_v60  ;;  %v4573_v1 = vld [vmem:[#allocation79_spill] sm:$0xff] }
 0x31f   :  { %v2510_v0 = vrot.slane %v2502_v15, %v4470_v30  ;;  %v1756_v58 = vmul.f32 %v4013_v31, %v4567_v8  ;;  %v1757_v2 = vmul.f32 %v4021_v17, %v4568_v54  ;;  %v2275_v45 = vcombine.low %v2266_v27, %v2273_v22 }
 0x320   :  { %v2503_v34 = vcombine.low %v2494_v25, %v2501_v59  ;;  %v1758_v14 = vmul.f32 %v4029_v21, %v4569_v6  ;;  %v2291_v29 = vcombine.low %v1751_v43, %v1752_v18  ;;  %v2292_v57 = vcombine.low %v1753_v38, %v1754_v44  ;;  %v4576_v18 = vld [vmem:[#allocation75_spill] sm:$0xff]  ;;  %v4577_v38 = vld [vmem:[#allocation74_spill] sm:$0xff] }
 0x321   :  { %v2293_v28 = vcombine.low %v1755_v56, %v1756_v58  ;;  %v4572_v4 = vrot.slane %v4571_v19, %v4541_v52  ;;  %v4575_v62 = vrot.slane %v4574_v40, %v4541_v52  ;;  %v2289_v27 = vrot.slane %v2275_v45, %v4470_v30  ;;  %v4578_v44 = vld [vmem:[#allocation78_spill] sm:$0xff]  ;;  %v4579_v56 = vld [vmem:[#allocation76_spill] sm:$0xff] }
 0x322   :  { %v2517_v26 = vrot.slane %v2503_v34, %v4470_v30  ;;  %v2294_v9 = vcombine.low %v1757_v2, %v1758_v14  ;;  %v2301_v25 = vrot.slane %v2291_v29, %v4470_v30  ;;  %v2308_v43 = vrot.slane %v2292_v57, %v4470_v30  ;;  %v4581_v2 = vld [vmem:[#allocation20_spill] sm:$0xff]  ;;  %v4582_v57 = vld [vmem:[#allocation65_spill] sm:$0xff] }
 0x323   :  { %v2092_v23 = vsub.f32 %v4572_v4, %v4570_v24  ;;  %v2094_v53 = vsub.f32 %v4575_v62, %v4573_v1  ;;  %v2315_v15 = vrot.slane %v2293_v28, %v4470_v30  ;;  %v2519_v22 = vcombine.low %v4577_v38, %v4576_v18  ;;  %v4580_v4 = vld [vmem:[#allocation18_spill] sm:$0xff]  ;;  %v4583_v40 = vld [vmem:[#allocation84_spill] sm:$0xff]  ;;  %v4587_v18 = vld [vmem:[#allocation85_spill] sm:$0xff] }
 0x324   :  { %v2518_v59 = vcombine.low %v2510_v0, %v2517_v26  ;;  %v2520_v34 = vcombine.low %v4579_v56, %v4578_v44  ;;  %v2290_v58 = vcombine.low %v2282_v13, %v2289_v27  ;;  %v2322_v24 = vrot.slane %v2294_v9, %v4470_v30  ;;  %v4584_v27 = vld [vmem:[#allocation63_spill] sm:$0xff] }
 0x325   :  { %v2323_v19 = vcombine.low %v2301_v25, %v2308_v43  ;;  %v2521_v45 = vcombine.low %v4580_v4, %v2092_v23  ;;  %v2522_v14 = vcombine.low %v4581_v2, %v2094_v53  ;;  %v2529_v0 = vrot.slane %v2519_v22, %v4470_v30  ;;  %v4585_v25 = vld [vmem:[#allocation64_spill] sm:$0xff] }
 0x326   :  { %2894 = vmatprep.mubr.msk.f32.mxu0 %vm2340_vm9, %v2518_v59  ;;  %v2536_v29 = vrot.slane %v2520_v34, %v4470_v30  ;;  %v1776_v26 = vmul.f32 %v4074_v49, %v4582_v57  ;;  %2889 = vmatprep.mubr.msk.f32.mxu1 %vm2340_vm9, %v2290_v58  ;;  %v2324_v28 = vcombine.low %v2315_v15, %v2322_v24  ;;  %v4586_v59 = vld [vmem:[#allocation67_spill] sm:$0xff]  ;;  %v4592_v4 = vld [vmem:[#allocation24_spill] sm:$0xff] }
 0x327   :  { %v2331_v13 = vrot.slane %v2323_v19, %v4470_v30  ;;  %v2543_v1 = vrot.slane %v2521_v45, %v4470_v30  ;;  %v1778_v23 = vmul.f32 %v4085_v41, %v4583_v40  ;;  %v2550_v62 = vrot.slane %v2522_v14, %v4470_v30  ;;  %v4594_v45 = vld [vmem:[#allocation25_spill] sm:$0xff]  ;;  %v4596_v14 = vld [vmem:[#allocation26_spill] sm:$0xff]  ;;  %v4598_v57 = vld [vmem:[#allocation27_spill] sm:$0xff] }
 0x328   :  { %v2551_v53 = vcombine.low %v2529_v0, %v2536_v29  ;;  %v1779_v9 = vmul.f32 %v4096_v63, %v4584_v27  ;;  %v1780_v43 = vmul.f32 %v4107_v61, %v4585_v25  ;;  %v2338_v49 = vrot.slane %v2324_v28, %v4470_v30  ;;  %v4604_v25 = vld [vmem:[#allocation73_spill] sm:$0xff] }
 0x329   :  { %v1781_v15 = vmul.f32 %v4120_v46, %v4586_v59  ;;  %v1782_v38 = vmul.f32 %v4128_v35, %v4587_v18  ;;  %v1807_v41 = vmul.f32 %v4077_v42, %v4537_v10  ;;  %v2552_v22 = vcombine.low %v2543_v1, %v2550_v62  ;;  %v4588_v10 = vld [vmem:[#allocation22_spill] sm:$0xff] }
 0x32a   :  { %v2559_v44 = vrot.slane %v2551_v53, %v4470_v30  ;;  %v1808_v56 = vmul.f32 %v1776_v26, %v4538_v36  ;;  %v1809_v63 = vmul.f32 %v4088_v39, %v4539_v3  ;;  %v2339_v61 = vcombine.low %v2331_v13, %v2338_v49  ;;  %v4590_v39 = vld [vmem:[#allocation23_spill] sm:$0xff]  ;;  %v4600_v13 = vld [vmem:[#allocation28_spill] sm:$0xff] }
 0x32b   :  { %v1810_v34 = vmul.f32 %v1778_v23, %v4543_v50  ;;  %v1811_v58 = vmul.f32 %v1779_v9, %v4548_v32  ;;  %v1812_v46 = vmul.f32 %v1780_v43, %v4555_v48  ;;  %v2566_v35 = vrot.slane %v2552_v22, %v4470_v30  ;;  %v4602_v23 = vld [vmem:[#allocation29_spill] sm:$0xff]  ;;  %v4605_v49 = vld [vmem:[#allocation80_spill] sm:$0xff] }
 0x32c   :  { %v1813_v24 = vmul.f32 %v1781_v15, %v4558_v20  ;;  %v1814_v42 = vmul.f32 %v1782_v38, %v4561_v33  ;;  %v4589_v19 = vrot.slane %v4588_v10, %v4541_v52  ;;  %2890 = vmatmul.mubr.msk.f32.gmra.mrb[6].mxu1 %vm2340_vm9, %v2339_v61  ;;  %v4591_v3 = vrot.slane %v4590_v39, %v4541_v52  ;;  %v4606_v38 = vld [vmem:[#allocation5_spill] sm:$0xff]  ;;  %v4608_v61 = vld [vmem:[#allocation82_spill] sm:$0xff] }
 0x32d   :  { %v4593_v32 = vrot.slane %v4592_v4, %v4541_v52  ;;  %v4595_v2 = vrot.slane %v4594_v45, %v4541_v52  ;;  %v4597_v33 = vrot.slane %v4596_v14, %v4541_v52  ;;  %v2567_v29 = vcombine.low %v2559_v44, %v2566_v35  ;;  %v4607_v22 = vld [vmem:[#allocation81_spill] sm:$0xff]  ;;  %v4616_v4 = vld [vmem:[#allocation42_spill] sm:$0xff] }
 0x32e   :  { %v2095_v36 = vsub.f32 %v4589_v19, %v1807_v41  ;;  %v2096_v50 = vsub.f32 %v4591_v3, %v1808_v56  ;;  %v4599_v26 = vrot.slane %v4598_v57, %v4541_v52  ;;  %v4601_v1 = vrot.slane %v4600_v13, %v4541_v52  ;;  %v4612_v3 = vld [vmem:[#allocation31_spill] sm:$0xff]  ;;  %v4624_v57 = vld [vmem:[#allocation62_spill] sm:$0xff] }
 0x32f   :  { %v2097_v48 = vsub.f32 %v4593_v32, %v1809_v63  ;;  %v2098_v20 = vsub.f32 %v4595_v2, %v1810_v34  ;;  %v2099_v0 = vsub.f32 %v4597_v33, %v1811_v58  ;;  %v4603_v62 = vrot.slane %v4602_v23, %v4541_v52  ;;  %2895 = vmatmul.mubr.msk.f32.vlgmr.msra.gmra.mrb[8].mxu0 %vm2340_vm9, %v2567_v29  ;;  %v4609_v34 = vld [vmem:[#allocation83_spill] sm:$0xff]  ;;  %v4620_v2 = vld [vmem:[#allocation44_spill] sm:$0xff]  ;;  %v4622_v33 = vld [vmem:[#allocation61_spill] sm:$0xff] }
 0x330   :  { %v2100_v28 = vsub.f32 %v4599_v26, %v1812_v46  ;;  %v2101_v40 = vsub.f32 %v4601_v1, %v1813_v24  ;;  %v2568_v27 = vcombine.low %v2095_v36, %v2096_v50  ;;  %v1784_v43 = vmul.f32 %v4001_v5, %v4604_v25  ;;  %v4618_v32 = vld [vmem:[#allocation43_spill] sm:$0xff] }
 0x331   :  { %v2102_v53 = vsub.f32 %v4603_v62, %v1814_v42  ;;  %v2569_v9 = vcombine.low %v2097_v48, %v2098_v20  ;;  %v1786_v59 = vmul.f32 %v4007_v16, %v4605_v49  ;;  %v1787_v41 = vmul.f32 %v3995_v11, %v4606_v38  ;;  %v4626_v38 = vld [vmem:[#allocation6_spill] sm:$0xff] }
 0x332   :  { %v2570_v15 = vcombine.low %v2099_v0, %v2100_v28  ;;  %v1788_v44 = vmul.f32 %v4013_v31, %v4607_v22  ;;  %v2578_v56 = vrot.slane %v2568_v27, %v4470_v30  ;;  %v1789_v5 = vmul.f32 %v4021_v17, %v4608_v61  ;;  %v4628_v61 = vld [vmem:[#allocation8_spill] sm:$0xff] }
 0x333   :  { %v2571_v18 = vcombine.low %v2101_v40, %v2102_v53  ;;  %v2585_v63 = vrot.slane %v2569_v9, %v4470_v30  ;;  %v1790_v16 = vmul.f32 %v4029_v21, %v4609_v34  ;;  %v1815_v11 = vmul.f32 %v3999_v7, %v4562_v51  ;;  %v4610_v7 = vld [vmem:[#allocation30_spill] sm:$0xff] }
 0x334   :  { %v2592_v58 = vrot.slane %v2570_v15, %v4470_v30  ;;  %v1816_v35 = vmul.f32 %v1784_v43, %v4563_v12  ;;  %v1817_v24 = vmul.f32 %v4011_v37, %v4564_v47  ;;  %v1818_v42 = vmul.f32 %v1786_v59, %v4565_v55  ;;  %v4614_v55 = vld [vmem:[#allocation41_spill] sm:$0xff] }
 0x335   :  { %v2599_v46 = vrot.slane %v2571_v18, %v4470_v30  ;;  %v2600_v31 = vcombine.low %v2578_v56, %v2585_v63  ;;  %v1819_v17 = vmul.f32 %v1787_v41, %v4566_v60  ;;  %v1820_v21 = vmul.f32 %v1788_v44, %v4567_v8  ;;  %v4627_v44 = vld [vmem:[#allocation7_spill] sm:$0xff] }
 0x336   :  { %v1821_v19 = vmul.f32 %v1789_v5, %v4568_v54  ;;  %v1822_v36 = vmul.f32 %v1790_v16, %v4569_v6  ;;  %v4611_v51 = vrot.slane %v4610_v7, %v4541_v52  ;;  %v4613_v37 = vrot.slane %v4612_v3, %v4541_v52  ;;  %v4629_v16 = vld [vmem:[#allocation9_spill] sm:$0xff] }
 0x337   :  { %v2601_v10 = vcombine.low %v2592_v58, %v2599_v46  ;;  %v2608_v39 = vrot.slane %v2600_v31, %v4470_v30  ;;  %v4615_v60 = vrot.slane %v4614_v55, %v4541_v52  ;;  %v4617_v54 = vrot.slane %v4616_v4, %v4541_v52 }
 0x338   :  { %v2103_v12 = vsub.f32 %v4611_v51, %v1815_v11  ;;  %v2104_v47 = vsub.f32 %v4613_v37, %v1816_v35  ;;  %v4619_v48 = vrot.slane %v4618_v32, %v4541_v52  ;;  %v4621_v20 = vrot.slane %v4620_v2, %v4541_v52 }
 0x339   :  { %v2105_v50 = vsub.f32 %v4615_v60, %v1817_v24  ;;  %v2615_v8 = vrot.slane %v2601_v10, %v4470_v30  ;;  %v2106_v6 = vsub.f32 %v4617_v54, %v1818_v42  ;;  %v4623_v0 = vrot.slane %v4622_v33, %v4541_v52 }
 0x33a   :  { %v2107_v45 = vsub.f32 %v4619_v48, %v1819_v17  ;;  %v2108_v14 = vsub.f32 %v4621_v20, %v1820_v21  ;;  %v4625_v26 = vrot.slane %v4624_v57, %v4541_v52  ;;  %v2617_v13 = vcombine.low %v2103_v12, %v2104_v47 }
 0x33b   :  { %v2109_v29 = vsub.f32 %v4623_v0, %v1821_v19  ;;  %v2616_v1 = vcombine.low %v2608_v39, %v2615_v8  ;;  %v2618_v40 = vcombine.low %v2105_v50, %v2106_v6 }
 0x33c   :  { %v2110_v28 = vsub.f32 %v4625_v26, %v1822_v36  ;;  %v2619_v23 = vcombine.low %v2107_v45, %v2108_v14  ;;  %v2627_v53 = vrot.slane %v2617_v13, %v4470_v30 }
 0x33d   :  { %2897 = vmatprep.mubr.msk.f32.mxu0 %vm2340_vm9, %v2616_v1  ;;  %v2634_v27 = vrot.slane %v2618_v40, %v4470_v30 }
 0x33e   :  { %v2620_v62 = vcombine.low %v2109_v29, %v2110_v28  ;;  %v2641_v9 = vrot.slane %v2619_v23, %v4470_v30 }
 0x33f   :  { %v2649_v43 = vcombine.low %v2627_v53, %v2634_v27 }
 0x340   :  { %v2648_v25 = vrot.slane %v2620_v62, %v4470_v30 }
 0x341   :  { %v2657_v52 = vrot.slane %v2649_v43, %v4470_v30 }
 0x342   :  { %v2650_v49 = vcombine.low %v2641_v9, %v2648_v25 }
 0x344   :  { %v2664_v59 = vrot.slane %v2650_v49, %v4470_v30 }
 0x346   :  { %v2665_v15 = vcombine.low %v2657_v52, %v2664_v59 }
 0x348   :  { %2898 = vmatmul.mubr.msk.f32.gmra.mrb[10].mxu0 %vm2340_vm9, %v2665_v15 }
 0x3e8   :  { %v2888_v18 = vpop.f32.mrb[4].mxu1 }
 0x3e9   :  { %v2760_v41 = vmul.f32 %v2888_v18, %v4626_v38  ;;  %v2419_v22 = vpop.f32.mrb[5].mxu1 }
 0x3ea   :  { %v2759_v56 = vmul.f32 %v2419_v22, %v4627_v44 }
 0x3ff   :  { %v2891_v63 = vpop.f32.mrb[6].mxu1 }
 0x400   :  { %v2762_v5 = vmul.f32 %v2891_v63, %v4628_v61  ;;  %v2429_v34 = vpop.f32.mrb[7].mxu1 }
 0x401   :  { %v2761_v58 = vmul.f32 %v2429_v34, %v4629_v16 }
 0x402   :  { %v2896_v46 = vpop.f32.mrb[8].mxu0 }
 0x403   :  { %v2764_v11 = vadd.f32 %v2896_v46, %v2760_v41  ;;  %v2740_v35 = vpop.f32.mrb[9].mxu0 }
 0x404   :  { %v2763_v31 = vadd.f32 %v2759_v56, %v2740_v35 }
 0x405   :  { %v2768_v30 = vmax.f32 %v2764_v11, 0.0 }
 0x406   :  { %v2767_v24 = vmax.f32 %v2763_v31, 0.0 }
 0x407   :  { %2772 = vst.msk [vmem:[#allocation2 + $0x8] sm:$0xff] %vm179_vm7, %v2768_v30 }
 0x408   :  { %2771 = vst.msk [vmem:[#allocation2] sm:$0xff] %vm179_vm7, %v2767_v24 }
 0x41b   :  { %v2899_v42 = vpop.f32.mrb[10].mxu0 }
 0x41c   :  { %v2766_v17 = vadd.f32 %v2899_v42, %v2762_v5  ;;  %v2750_v10 = vpop.f32.mrb[11].mxu0 }
 0x41d   :  { %v2765_v21 = vadd.f32 %v2761_v58, %v2750_v10 }
 0x41e   :  { %v2770_v19 = vmax.f32 %v2766_v17, 0.0 }
 0x41f   :  { %v2769_v36 = vmax.f32 %v2765_v21, 0.0 }
 0x420   :  { %2774 = vst.msk [vmem:[#allocation2 + $0x18] sm:$0xff] %vm179_vm7, %v2770_v19 }
 0x421   :  { %2773 = vst.msk [vmem:[#allocation2 + $0x10] sm:$0xff] %vm179_vm7, %v2769_v36 }
 0x422   :  { %3024 = shalt.err (!%p3021_p4)
}
 0x423   :  { %s3025_s15 = scalar_lea.hbm %s4326_s6, 512 }
 0x424   :  { %p3026_p5 = scmp.ne.s32.totalorder %s4326_s6, %s3025_s15  ;;  %p3029_p6 = scmp.lt.u32.totalorder %s3025_s15, %s4326_s6 }
 0x426   :  { %p3031_p7 = pnand %p3029_p6, %p3026_p5 }
 0x428   :  { %3034 = shalt.err (!%p3031_p7)
}
 0x429   :  { %s3047_s19 = smov 128   ;;  %s3048_s20 = smov 8  }
 0x42a   :  { %2786 = dma.vmem_to_hbm [thread:$0]  %s2781_s11, 512, %s4326_s6, [#allocation3], %s3047_s19, %s3047_s19, %s3048_s20  }
 0x42b   :  { %3035 = dma.done.wait [#allocation3], 512  }
 0x42c   :  { %3036 = vsyncadd [#allocation3], 4294966784 }
 0x42d   :  { %2790 = vsyncpa [#allocation3], 1 }

</bundles_post_ra>
